<compile_context>
chip_gen: v6e
topology: v6e:2x2x1
jax: 0.10.0
libtpu: 0.0.40
codegen_flags: <defaults>
</compile_context>

<pallas_src>
import jax
import jax.numpy as jnp
from jax.experimental import pallas as pl
from jax.experimental.pallas import tpu as pltpu


_VMEM = pl.BlockSpec(memory_space=pltpu.MemorySpace.VMEM)


# ---------------------------------------------------------------------------
# Fused kernel: all LSTM layers (wavefront) + MLP head in one pallas_call.
# ---------------------------------------------------------------------------
def _make_fused_lstm_kernel(num_layers, T, Bp, H):
    """Build the fused kernel for static (num_layers, T, padded-batch Bp, H).

    Ref order (positional):
      x_flat (T*Bp, I)  bf16,
      [w_ih_l (D_in_l,4H) bf16, w_hh_l (H,4H) bf16, b_l (1,4H) f32] * L,
      w1 (H,16), b1 (1,16), w2 (16,8), b2 (1,8), w3 (8,1), b3 (1,1)   (f32),
      out (Bp, 1) f32
    """
    f32 = jnp.float32
    bf16 = jnp.bfloat16

    def kernel(*refs):
        x_ref = refs[0]
        pos = 1
        layer_refs = []
        for _ in range(num_layers):
            layer_refs.append((refs[pos], refs[pos + 1], refs[pos + 2]))
            pos += 3
        w1_ref, b1_ref, w2_ref, b2_ref, w3_ref, b3_ref = refs[pos:pos + 6]
        out_ref = refs[pos + 6]

        # ---- hoisted, off-chain work -------------------------------------
        w_ih0_ref, w_hh0_ref, b0_ref = layer_refs[0]
        # Layer-0 input projection + bias for ALL timesteps at once; kept as
        # a value ((T*Bp,4H) f32 = a handful of vregs), statically sliced
        # per step -- no VMEM scratch round-trip.
        gx0 = (jnp.dot(x_ref[...], w_ih0_ref[...],
                       preferred_element_type=f32)
               + b0_ref[...])
        w_hh0 = w_hh0_ref[...]                       # (H, 4H) bf16

        # Upper-layer weights read once; biases pre-broadcast (hoisted out of
        # the time loop -- broadcast_in_dim is not CSE'd).
        upper = []
        for l in range(1, num_layers):
            w_ih_ref, w_hh_ref, b_ref = layer_refs[l]
            upper.append((w_ih_ref[...], w_hh_ref[...],
                          jnp.broadcast_to(b_ref[...], (Bp, 4 * H))))

        zeros = jnp.zeros((Bp, H), f32)
        h = [zeros] * num_layers
        c = [zeros] * num_layers

        def cell(gates, c_prev):
            # Full-tile nonlinearities on the (Bp,4H) = (8,128) gates tile.
            # sigmoid(x) = 0.5*tanh(0.5x)+0.5  -> one EUP push (no exp+recip).
            sig = 0.5 * jnp.tanh(0.5 * gates) + 0.5
            tnh = jnp.tanh(gates)
            i_g = sig[:, 0:H]
            f_g = sig[:, H:2 * H]
            o_g = sig[:, 3 * H:4 * H]
            g_g = tnh[:, 2 * H:3 * H]
            c_new = f_g * c_prev + i_g * g_g
            h_new = o_g * jnp.tanh(c_new)
            return h_new, c_new

        # ---- wavefront over (layer, time) --------------------------------
        # Diagonal d holds cells {(l, t) : l + t == d}; they are mutually
        # independent.  Within a diagonal we go in DECREASING l so that cell
        # (l, t) reads h[l-1] before cell (l-1, t+1) overwrites it.
        for d in range(T + num_layers - 1):
            l_hi = min(d, num_layers - 1)
            l_lo = max(0, d - (T - 1))
            for l in range(l_hi, l_lo - 1, -1):
                t = d - l
                if l == 0:
                    gates = (gx0[t * Bp:(t + 1) * Bp, :]
                             + jnp.dot(h[0].astype(bf16), w_hh0,
                                       preferred_element_type=f32))
                else:
                    w_ih_l, w_hh_l, b_full = upper[l - 1]
                    # Two independent small dots -> pipelined in the MXU.
                    gates = (b_full
                             + jnp.dot(h[l - 1].astype(bf16), w_ih_l,
                                       preferred_element_type=f32)
                             + jnp.dot(h[l].astype(bf16), w_hh_l,
                                       preferred_element_type=f32))
                h[l], c[l] = cell(gates, c[l])
            # TODO(synk): training-mode inter-layer dropout not implemented.

        # ---- MLP head (eval-mode dropout == identity), f32 ----------------
        hn_o = h[num_layers - 1]          # hn[-1, :, :]
        hn_1 = h[1]                       # hn[ 1, :, :]  (needs L >= 2)
        hidden = jnp.maximum(hn_o + hn_1, 0.0)
        hidden = jnp.maximum(
            jnp.dot(hidden, w1_ref[...], preferred_element_type=f32)
            + b1_ref[...], 0.0)
        hidden = jnp.maximum(
            jnp.dot(hidden, w2_ref[...], preferred_element_type=f32)
            + b2_ref[...], 0.0)
        out_ref[...] = (
            jnp.dot(hidden, w3_ref[...], preferred_element_type=f32)
            + b3_ref[...])

    return kernel


# ---------------------------------------------------------------------------
# Wrapper
# ---------------------------------------------------------------------------
def lstm_forward(x, lstm_params, head_params, hidden_size):
    """x: (B, T, input_size) batch_first, matching the PyTorch module."""
    B, T, I = x.shape
    num_layers = len(lstm_params)
    assert num_layers >= 2, "head uses hn[1]; the module needs num_layers >= 2"
    H = hidden_size

    # Pad batch (sublane dim) to a multiple of 8 so every per-step tile is
    # (8,128)-aligned; padded rows are independent and dropped at the end.
    # Flatten time-major to (T*Bp, I) so the layer-0 input projection is one
    # matmul.
    Bp = ((B + 7) // 8) * 8
    x_tm = jnp.transpose(x, (1, 0, 2)).astype(jnp.float32)         # (T, B, I)
    if Bp != B:
        x_tm = jnp.pad(x_tm, ((0, 0), (0, Bp - B), (0, 0)))
    # bf16 matmul operands (MXU-native); accumulation / state stay f32.
    x_flat = x_tm.reshape(T * Bp, I).astype(jnp.bfloat16)

    kernel = _make_fused_lstm_kernel(num_layers, T, Bp, H)

    args = [x_flat]
    for (w_ih, w_hh, b) in lstm_params:
        args.extend([w_ih.astype(jnp.bfloat16),
                     w_hh.astype(jnp.bfloat16),
                     b.astype(jnp.float32)])
    args.extend([p.astype(jnp.float32) for p in head_params])

    # Tiny footprint (everything resident in VMEM, no scratches): no grid.
    # TODO(synk): for large T*B*H, chunk the time axis with a grid and
    # pl.Buffered specs instead of growing residency (v7x VMEM is 64 MiB).
    out_padded = pl.pallas_call(
        kernel,
        out_shape=jax.ShapeDtypeStruct((Bp, 1), jnp.float32),
        in_specs=[_VMEM] * len(args),
        out_specs=_VMEM,
    )(*args)
    return out_padded[:B]


# ---------------------------------------------------------------------------
# Deterministic parameter init (shapes match torch.nn.LSTM / nn.Linear)
# ---------------------------------------------------------------------------
def init_params(key, input_size, hidden_size, num_layers):
    H = hidden_size
    bound = 1.0 / (H ** 0.5)
    lstm_params = []
    for layer in range(num_layers):
        d_in = input_size if layer == 0 else H
        key, k1, k2, k3, k4 = jax.random.split(key, 5)
        w_ih = jax.random.uniform(k1, (d_in, 4 * H), jnp.float32, -bound, bound)
        w_hh = jax.random.uniform(k2, (H, 4 * H), jnp.float32, -bound, bound)
        b_ih = jax.random.uniform(k3, (4 * H,), jnp.float32, -bound, bound)
        b_hh = jax.random.uniform(k4, (4 * H,), jnp.float32, -bound, bound)
        lstm_params.append((w_ih, w_hh, (b_ih + b_hh).reshape(1, 4 * H)))

    def linear(key, d_in, d_out):
        b = 1.0 / (d_in ** 0.5)
        kw, kb = jax.random.split(key)
        w = jax.random.uniform(kw, (d_in, d_out), jnp.float32, -b, b)
        bias = jax.random.uniform(kb, (1, d_out), jnp.float32, -b, b)
        return w, bias

    key, kf1, kf2, kf3 = jax.random.split(key, 4)
    w1, b1 = linear(kf1, H, 16)
    w2, b2 = linear(kf2, 16, 8)
    w3, b3 = linear(kf3, 8, 1)
    head_params = (w1, b1, w2, b2, w3, b3)
    return lstm_params, head_params


# ---------------------------------------------------------------------------
if __name__ == "__main__":
    input_size = 4
    hidden_size = 32
    num_layers = 3          # >= 2 so hn[1] and hn[-1] are both valid
    seq_length = 8
    batch = 2

    key = jax.random.PRNGKey(0)
    key, kx = jax.random.split(key)
    x = jax.random.normal(kx, (batch, seq_length, input_size), jnp.float32)

    lstm_params, head_params = init_params(key, input_size, hidden_size,
                                           num_layers)

    out = lstm_forward(x, lstm_params, head_params, hidden_size)
    out = jax.block_until_ready(out)
    assert out.shape == (batch, 1), out.shape
    print("KERNEL_OK")
</pallas_src>

<mosaic_0001>
module attributes {stable_mosaic.version = 11 : i64} {
  func.func @kernel(%arg0: memref<64x4xbf16, #tpu.memory_space<vmem>>, %arg1: memref<4x128xbf16, #tpu.memory_space<vmem>>, %arg2: memref<32x128xbf16, #tpu.memory_space<vmem>>, %arg3: memref<1x128xf32, #tpu.memory_space<vmem>>, %arg4: memref<32x128xbf16, #tpu.memory_space<vmem>>, %arg5: memref<32x128xbf16, #tpu.memory_space<vmem>>, %arg6: memref<1x128xf32, #tpu.memory_space<vmem>>, %arg7: memref<32x128xbf16, #tpu.memory_space<vmem>>, %arg8: memref<32x128xbf16, #tpu.memory_space<vmem>>, %arg9: memref<1x128xf32, #tpu.memory_space<vmem>>, %arg10: memref<32x16xf32, #tpu.memory_space<vmem>>, %arg11: memref<1x16xf32, #tpu.memory_space<vmem>>, %arg12: memref<16x8xf32, #tpu.memory_space<vmem>>, %arg13: memref<1x8xf32, #tpu.memory_space<vmem>>, %arg14: memref<8x1xf32, #tpu.memory_space<vmem>>, %arg15: memref<1x1xf32, #tpu.memory_space<vmem>>, %arg16: memref<8x1xf32, #tpu.memory_space<vmem>>) attributes {dimension_semantics = [], scalar_prefetch = 0 : i64, scratch_operands = 0 : i64, tpu.core_type = #tpu.core_type<tc>} {
    %c0 = arith.constant 0 : index
    %c0_0 = arith.constant 0 : index
    %0 = vector.load %arg0[%c0, %c0_0] : memref<64x4xbf16, #tpu.memory_space<vmem>>, vector<64x4xbf16>
    %c0_1 = arith.constant 0 : index
    %c0_2 = arith.constant 0 : index
    %1 = vector.load %arg1[%c0_1, %c0_2] : memref<4x128xbf16, #tpu.memory_space<vmem>>, vector<4x128xbf16>
    %cst = arith.constant dense<0.000000e+00> : vector<64x128xf32>
    %2 = tpu.matmul %0, %1, %cst {dimension_numbers = #tpu.dot_dimension_numbers<[1], [0], [0], [1], [0, 0, 1, 1], [], []>} : vector<64x4xbf16>, vector<4x128xbf16>, vector<64x128xf32> -> vector<64x128xf32>
    %c0_3 = arith.constant 0 : index
    %c0_4 = arith.constant 0 : index
    %3 = vector.load %arg3[%c0_3, %c0_4] : memref<1x128xf32, #tpu.memory_space<vmem>>, vector<1x128xf32>
    %4 = vector.broadcast %3 : vector<1x128xf32> to vector<64x128xf32>
    %5 = arith.addf %2, %4 : vector<64x128xf32>
    %c0_5 = arith.constant 0 : index
    %c0_6 = arith.constant 0 : index
    %6 = vector.load %arg2[%c0_5, %c0_6] : memref<32x128xbf16, #tpu.memory_space<vmem>>, vector<32x128xbf16>
    %c0_7 = arith.constant 0 : index
    %c0_8 = arith.constant 0 : index
    %7 = vector.load %arg4[%c0_7, %c0_8] : memref<32x128xbf16, #tpu.memory_space<vmem>>, vector<32x128xbf16>
    %c0_9 = arith.constant 0 : index
    %c0_10 = arith.constant 0 : index
    %8 = vector.load %arg5[%c0_9, %c0_10] : memref<32x128xbf16, #tpu.memory_space<vmem>>, vector<32x128xbf16>
    %c0_11 = arith.constant 0 : index
    %c0_12 = arith.constant 0 : index
    %9 = vector.load %arg6[%c0_11, %c0_12] : memref<1x128xf32, #tpu.memory_space<vmem>>, vector<1x128xf32>
    %10 = vector.shape_cast %9 : vector<1x128xf32> to vector<1x128xf32>
    %11 = vector.broadcast %10 : vector<1x128xf32> to vector<8x128xf32>
    %c0_13 = arith.constant 0 : index
    %c0_14 = arith.constant 0 : index
    %12 = vector.load %arg7[%c0_13, %c0_14] : memref<32x128xbf16, #tpu.memory_space<vmem>>, vector<32x128xbf16>
    %c0_15 = arith.constant 0 : index
    %c0_16 = arith.constant 0 : index
    %13 = vector.load %arg8[%c0_15, %c0_16] : memref<32x128xbf16, #tpu.memory_space<vmem>>, vector<32x128xbf16>
    %c0_17 = arith.constant 0 : index
    %c0_18 = arith.constant 0 : index
    %14 = vector.load %arg9[%c0_17, %c0_18] : memref<1x128xf32, #tpu.memory_space<vmem>>, vector<1x128xf32>
    %15 = vector.shape_cast %14 : vector<1x128xf32> to vector<1x128xf32>
    %16 = vector.broadcast %15 : vector<1x128xf32> to vector<8x128xf32>
    %cst_19 = arith.constant 0.000000e+00 : f32
    %17 = vector.broadcast %cst_19 : f32 to vector<8x32xf32>
    %18 = vector.extract_strided_slice %5 {offsets = [0, 0], sizes = [8, 128], strides = [1, 1]} : vector<64x128xf32> to vector<8x128xf32>
    %19 = arith.truncf %17 : vector<8x32xf32> to vector<8x32xbf16>
    %cst_20 = arith.constant dense<0.000000e+00> : vector<8x128xf32>
    %20 = tpu.matmul %19, %6, %cst_20 {dimension_numbers = #tpu.dot_dimension_numbers<[1], [0], [0], [1], [0, 0, 1, 1], [], []>} : vector<8x32xbf16>, vector<32x128xbf16>, vector<8x128xf32> -> vector<8x128xf32>
    %21 = arith.addf %18, %20 : vector<8x128xf32>
    %cst_21 = arith.constant 5.000000e-01 : f32
    %22 = vector.broadcast %cst_21 : f32 to vector<8x128xf32>
    %23 = arith.mulf %22, %21 : vector<8x128xf32>
    %24 = math.tanh %23 : vector<8x128xf32>
    %cst_22 = arith.constant 5.000000e-01 : f32
    %25 = vector.broadcast %cst_22 : f32 to vector<8x128xf32>
    %26 = arith.mulf %25, %24 : vector<8x128xf32>
    %cst_23 = arith.constant 5.000000e-01 : f32
    %27 = vector.broadcast %cst_23 : f32 to vector<8x128xf32>
    %28 = arith.addf %26, %27 : vector<8x128xf32>
    %29 = math.tanh %21 : vector<8x128xf32>
    %30 = vector.extract_strided_slice %28 {offsets = [0, 0], sizes = [8, 32], strides = [1, 1]} : vector<8x128xf32> to vector<8x32xf32>
    %31 = vector.extract_strided_slice %28 {offsets = [0, 32], sizes = [8, 32], strides = [1, 1]} : vector<8x128xf32> to vector<8x32xf32>
    %32 = vector.extract_strided_slice %28 {offsets = [0, 96], sizes = [8, 32], strides = [1, 1]} : vector<8x128xf32> to vector<8x32xf32>
    %33 = vector.extract_strided_slice %29 {offsets = [0, 64], sizes = [8, 32], strides = [1, 1]} : vector<8x128xf32> to vector<8x32xf32>
    %34 = arith.mulf %31, %17 : vector<8x32xf32>
    %35 = arith.mulf %30, %33 : vector<8x32xf32>
    %36 = arith.addf %34, %35 : vector<8x32xf32>
    %37 = math.tanh %36 : vector<8x32xf32>
    %38 = arith.mulf %32, %37 : vector<8x32xf32>
    %39 = arith.truncf %38 : vector<8x32xf32> to vector<8x32xbf16>
    %cst_24 = arith.constant dense<0.000000e+00> : vector<8x128xf32>
    %40 = tpu.matmul %39, %7, %cst_24 {dimension_numbers = #tpu.dot_dimension_numbers<[1], [0], [0], [1], [0, 0, 1, 1], [], []>} : vector<8x32xbf16>, vector<32x128xbf16>, vector<8x128xf32> -> vector<8x128xf32>
    %41 = arith.addf %11, %40 : vector<8x128xf32>
    %42 = arith.truncf %17 : vector<8x32xf32> to vector<8x32xbf16>
    %cst_25 = arith.constant dense<0.000000e+00> : vector<8x128xf32>
    %43 = tpu.matmul %42, %8, %cst_25 {dimension_numbers = #tpu.dot_dimension_numbers<[1], [0], [0], [1], [0, 0, 1, 1], [], []>} : vector<8x32xbf16>, vector<32x128xbf16>, vector<8x128xf32> -> vector<8x128xf32>
    %44 = arith.addf %41, %43 : vector<8x128xf32>
    %cst_26 = arith.constant 5.000000e-01 : f32
    %45 = vector.broadcast %cst_26 : f32 to vector<8x128xf32>
    %46 = arith.mulf %45, %44 : vector<8x128xf32>
    %47 = math.tanh %46 : vector<8x128xf32>
    %cst_27 = arith.constant 5.000000e-01 : f32
    %48 = vector.broadcast %cst_27 : f32 to vector<8x128xf32>
    %49 = arith.mulf %48, %47 : vector<8x128xf32>
    %cst_28 = arith.constant 5.000000e-01 : f32
    %50 = vector.broadcast %cst_28 : f32 to vector<8x128xf32>
    %51 = arith.addf %49, %50 : vector<8x128xf32>
    %52 = math.tanh %44 : vector<8x128xf32>
    %53 = vector.extract_strided_slice %51 {offsets = [0, 0], sizes = [8, 32], strides = [1, 1]} : vector<8x128xf32> to vector<8x32xf32>
    %54 = vector.extract_strided_slice %51 {offsets = [0, 32], sizes = [8, 32], strides = [1, 1]} : vector<8x128xf32> to vector<8x32xf32>
    %55 = vector.extract_strided_slice %51 {offsets = [0, 96], sizes = [8, 32], strides = [1, 1]} : vector<8x128xf32> to vector<8x32xf32>
    %56 = vector.extract_strided_slice %52 {offsets = [0, 64], sizes = [8, 32], strides = [1, 1]} : vector<8x128xf32> to vector<8x32xf32>
    %57 = arith.mulf %54, %17 : vector<8x32xf32>
    %58 = arith.mulf %53, %56 : vector<8x32xf32>
    %59 = arith.addf %57, %58 : vector<8x32xf32>
    %60 = math.tanh %59 : vector<8x32xf32>
    %61 = arith.mulf %55, %60 : vector<8x32xf32>
    %62 = vector.extract_strided_slice %5 {offsets = [8, 0], sizes = [8, 128], strides = [1, 1]} : vector<64x128xf32> to vector<8x128xf32>
    %63 = arith.truncf %38 : vector<8x32xf32> to vector<8x32xbf16>
    %cst_29 = arith.constant dense<0.000000e+00> : vector<8x128xf32>
    %64 = tpu.matmul %63, %6, %cst_29 {dimension_numbers = #tpu.dot_dimension_numbers<[1], [0], [0], [1], [0, 0, 1, 1], [], []>} : vector<8x32xbf16>, vector<32x128xbf16>, vector<8x128xf32> -> vector<8x128xf32>
    %65 = arith.addf %62, %64 : vector<8x128xf32>
    %cst_30 = arith.constant 5.000000e-01 : f32
    %66 = vector.broadcast %cst_30 : f32 to vector<8x128xf32>
    %67 = arith.mulf %66, %65 : vector<8x128xf32>
    %68 = math.tanh %67 : vector<8x128xf32>
    %cst_31 = arith.constant 5.000000e-01 : f32
    %69 = vector.broadcast %cst_31 : f32 to vector<8x128xf32>
    %70 = arith.mulf %69, %68 : vector<8x128xf32>
    %cst_32 = arith.constant 5.000000e-01 : f32
    %71 = vector.broadcast %cst_32 : f32 to vector<8x128xf32>
    %72 = arith.addf %70, %71 : vector<8x128xf32>
    %73 = math.tanh %65 : vector<8x128xf32>
    %74 = vector.extract_strided_slice %72 {offsets = [0, 0], sizes = [8, 32], strides = [1, 1]} : vector<8x128xf32> to vector<8x32xf32>
    %75 = vector.extract_strided_slice %72 {offsets = [0, 32], sizes = [8, 32], strides = [1, 1]} : vector<8x128xf32> to vector<8x32xf32>
    %76 = vector.extract_strided_slice %72 {offsets = [0, 96], sizes = [8, 32], strides = [1, 1]} : vector<8x128xf32> to vector<8x32xf32>
    %77 = vector.extract_strided_slice %73 {offsets = [0, 64], sizes = [8, 32], strides = [1, 1]} : vector<8x128xf32> to vector<8x32xf32>
    %78 = arith.mulf %75, %36 : vector<8x32xf32>
    %79 = arith.mulf %74, %77 : vector<8x32xf32>
    %80 = arith.addf %78, %79 : vector<8x32xf32>
    %81 = math.tanh %80 : vector<8x32xf32>
    %82 = arith.mulf %76, %81 : vector<8x32xf32>
    %83 = arith.truncf %61 : vector<8x32xf32> to vector<8x32xbf16>
    %cst_33 = arith.constant dense<0.000000e+00> : vector<8x128xf32>
    %84 = tpu.matmul %83, %12, %cst_33 {dimension_numbers = #tpu.dot_dimension_numbers<[1], [0], [0], [1], [0, 0, 1, 1], [], []>} : vector<8x32xbf16>, vector<32x128xbf16>, vector<8x128xf32> -> vector<8x128xf32>
    %85 = arith.addf %16, %84 : vector<8x128xf32>
    %86 = arith.truncf %17 : vector<8x32xf32> to vector<8x32xbf16>
    %cst_34 = arith.constant dense<0.000000e+00> : vector<8x128xf32>
    %87 = tpu.matmul %86, %13, %cst_34 {dimension_numbers = #tpu.dot_dimension_numbers<[1], [0], [0], [1], [0, 0, 1, 1], [], []>} : vector<8x32xbf16>, vector<32x128xbf16>, vector<8x128xf32> -> vector<8x128xf32>
    %88 = arith.addf %85, %87 : vector<8x128xf32>
    %cst_35 = arith.constant 5.000000e-01 : f32
    %89 = vector.broadcast %cst_35 : f32 to vector<8x128xf32>
    %90 = arith.mulf %89, %88 : vector<8x128xf32>
    %91 = math.tanh %90 : vector<8x128xf32>
    %cst_36 = arith.constant 5.000000e-01 : f32
    %92 = vector.broadcast %cst_36 : f32 to vector<8x128xf32>
    %93 = arith.mulf %92, %91 : vector<8x128xf32>
    %cst_37 = arith.constant 5.000000e-01 : f32
    %94 = vector.broadcast %cst_37 : f32 to vector<8x128xf32>
    %95 = arith.addf %93, %94 : vector<8x128xf32>
    %96 = math.tanh %88 : vector<8x128xf32>
    %97 = vector.extract_strided_slice %95 {offsets = [0, 0], sizes = [8, 32], strides = [1, 1]} : vector<8x128xf32> to vector<8x32xf32>
    %98 = vector.extract_strided_slice %95 {offsets = [0, 32], sizes = [8, 32], strides = [1, 1]} : vector<8x128xf32> to vector<8x32xf32>
    %99 = vector.extract_strided_slice %95 {offsets = [0, 96], sizes = [8, 32], strides = [1, 1]} : vector<8x128xf32> to vector<8x32xf32>
    %100 = vector.extract_strided_slice %96 {offsets = [0, 64], sizes = [8, 32], strides = [1, 1]} : vector<8x128xf32> to vector<8x32xf32>
    %101 = arith.mulf %98, %17 : vector<8x32xf32>
    %102 = arith.mulf %97, %100 : vector<8x32xf32>
    %103 = arith.addf %101, %102 : vector<8x32xf32>
    %104 = math.tanh %103 : vector<8x32xf32>
    %105 = arith.mulf %99, %104 : vector<8x32xf32>
    %106 = arith.truncf %82 : vector<8x32xf32> to vector<8x32xbf16>
    %cst_38 = arith.constant dense<0.000000e+00> : vector<8x128xf32>
    %107 = tpu.matmul %106, %7, %cst_38 {dimension_numbers = #tpu.dot_dimension_numbers<[1], [0], [0], [1], [0, 0, 1, 1], [], []>} : vector<8x32xbf16>, vector<32x128xbf16>, vector<8x128xf32> -> vector<8x128xf32>
    %108 = arith.addf %11, %107 : vector<8x128xf32>
    %109 = arith.truncf %61 : vector<8x32xf32> to vector<8x32xbf16>
    %cst_39 = arith.constant dense<0.000000e+00> : vector<8x128xf32>
    %110 = tpu.matmul %109, %8, %cst_39 {dimension_numbers = #tpu.dot_dimension_numbers<[1], [0], [0], [1], [0, 0, 1, 1], [], []>} : vector<8x32xbf16>, vector<32x128xbf16>, vector<8x128xf32> -> vector<8x128xf32>
    %111 = arith.addf %108, %110 : vector<8x128xf32>
    %cst_40 = arith.constant 5.000000e-01 : f32
    %112 = vector.broadcast %cst_40 : f32 to vector<8x128xf32>
    %113 = arith.mulf %112, %111 : vector<8x128xf32>
    %114 = math.tanh %113 : vector<8x128xf32>
    %cst_41 = arith.constant 5.000000e-01 : f32
    %115 = vector.broadcast %cst_41 : f32 to vector<8x128xf32>
    %116 = arith.mulf %115, %114 : vector<8x128xf32>
    %cst_42 = arith.constant 5.000000e-01 : f32
    %117 = vector.broadcast %cst_42 : f32 to vector<8x128xf32>
    %118 = arith.addf %116, %117 : vector<8x128xf32>
    %119 = math.tanh %111 : vector<8x128xf32>
    %120 = vector.extract_strided_slice %118 {offsets = [0, 0], sizes = [8, 32], strides = [1, 1]} : vector<8x128xf32> to vector<8x32xf32>
    %121 = vector.extract_strided_slice %118 {offsets = [0, 32], sizes = [8, 32], strides = [1, 1]} : vector<8x128xf32> to vector<8x32xf32>
    %122 = vector.extract_strided_slice %118 {offsets = [0, 96], sizes = [8, 32], strides = [1, 1]} : vector<8x128xf32> to vector<8x32xf32>
    %123 = vector.extract_strided_slice %119 {offsets = [0, 64], sizes = [8, 32], strides = [1, 1]} : vector<8x128xf32> to vector<8x32xf32>
    %124 = arith.mulf %121, %59 : vector<8x32xf32>
    %125 = arith.mulf %120, %123 : vector<8x32xf32>
    %126 = arith.addf %124, %125 : vector<8x32xf32>
    %127 = math.tanh %126 : vector<8x32xf32>
    %128 = arith.mulf %122, %127 : vector<8x32xf32>
    %129 = vector.extract_strided_slice %5 {offsets = [16, 0], sizes = [8, 128], strides = [1, 1]} : vector<64x128xf32> to vector<8x128xf32>
    %130 = arith.truncf %82 : vector<8x32xf32> to vector<8x32xbf16>
    %cst_43 = arith.constant dense<0.000000e+00> : vector<8x128xf32>
    %131 = tpu.matmul %130, %6, %cst_43 {dimension_numbers = #tpu.dot_dimension_numbers<[1], [0], [0], [1], [0, 0, 1, 1], [], []>} : vector<8x32xbf16>, vector<32x128xbf16>, vector<8x128xf32> -> vector<8x128xf32>
    %132 = arith.addf %129, %131 : vector<8x128xf32>
    %cst_44 = arith.constant 5.000000e-01 : f32
    %133 = vector.broadcast %cst_44 : f32 to vector<8x128xf32>
    %134 = arith.mulf %133, %132 : vector<8x128xf32>
    %135 = math.tanh %134 : vector<8x128xf32>
    %cst_45 = arith.constant 5.000000e-01 : f32
    %136 = vector.broadcast %cst_45 : f32 to vector<8x128xf32>
    %137 = arith.mulf %136, %135 : vector<8x128xf32>
    %cst_46 = arith.constant 5.000000e-01 : f32
    %138 = vector.broadcast %cst_46 : f32 to vector<8x128xf32>
    %139 = arith.addf %137, %138 : vector<8x128xf32>
    %140 = math.tanh %132 : vector<8x128xf32>
    %141 = vector.extract_strided_slice %139 {offsets = [0, 0], sizes = [8, 32], strides = [1, 1]} : vector<8x128xf32> to vector<8x32xf32>
    %142 = vector.extract_strided_slice %139 {offsets = [0, 32], sizes = [8, 32], strides = [1, 1]} : vector<8x128xf32> to vector<8x32xf32>
    %143 = vector.extract_strided_slice %139 {offsets = [0, 96], sizes = [8, 32], strides = [1, 1]} : vector<8x128xf32> to vector<8x32xf32>
    %144 = vector.extract_strided_slice %140 {offsets = [0, 64], sizes = [8, 32], strides = [1, 1]} : vector<8x128xf32> to vector<8x32xf32>
    %145 = arith.mulf %142, %80 : vector<8x32xf32>
    %146 = arith.mulf %141, %144 : vector<8x32xf32>
    %147 = arith.addf %145, %146 : vector<8x32xf32>
    %148 = math.tanh %147 : vector<8x32xf32>
    %149 = arith.mulf %143, %148 : vector<8x32xf32>
    %150 = arith.truncf %128 : vector<8x32xf32> to vector<8x32xbf16>
    %cst_47 = arith.constant dense<0.000000e+00> : vector<8x128xf32>
    %151 = tpu.matmul %150, %12, %cst_47 {dimension_numbers = #tpu.dot_dimension_numbers<[1], [0], [0], [1], [0, 0, 1, 1], [], []>} : vector<8x32xbf16>, vector<32x128xbf16>, vector<8x128xf32> -> vector<8x128xf32>
    %152 = arith.addf %16, %151 : vector<8x128xf32>
    %153 = arith.truncf %105 : vector<8x32xf32> to vector<8x32xbf16>
    %cst_48 = arith.constant dense<0.000000e+00> : vector<8x128xf32>
    %154 = tpu.matmul %153, %13, %cst_48 {dimension_numbers = #tpu.dot_dimension_numbers<[1], [0], [0], [1], [0, 0, 1, 1], [], []>} : vector<8x32xbf16>, vector<32x128xbf16>, vector<8x128xf32> -> vector<8x128xf32>
    %155 = arith.addf %152, %154 : vector<8x128xf32>
    %cst_49 = arith.constant 5.000000e-01 : f32
    %156 = vector.broadcast %cst_49 : f32 to vector<8x128xf32>
    %157 = arith.mulf %156, %155 : vector<8x128xf32>
    %158 = math.tanh %157 : vector<8x128xf32>
    %cst_50 = arith.constant 5.000000e-01 : f32
    %159 = vector.broadcast %cst_50 : f32 to vector<8x128xf32>
    %160 = arith.mulf %159, %158 : vector<8x128xf32>
    %cst_51 = arith.constant 5.000000e-01 : f32
    %161 = vector.broadcast %cst_51 : f32 to vector<8x128xf32>
    %162 = arith.addf %160, %161 : vector<8x128xf32>
    %163 = math.tanh %155 : vector<8x128xf32>
    %164 = vector.extract_strided_slice %162 {offsets = [0, 0], sizes = [8, 32], strides = [1, 1]} : vector<8x128xf32> to vector<8x32xf32>
    %165 = vector.extract_strided_slice %162 {offsets = [0, 32], sizes = [8, 32], strides = [1, 1]} : vector<8x128xf32> to vector<8x32xf32>
    %166 = vector.extract_strided_slice %162 {offsets = [0, 96], sizes = [8, 32], strides = [1, 1]} : vector<8x128xf32> to vector<8x32xf32>
    %167 = vector.extract_strided_slice %163 {offsets = [0, 64], sizes = [8, 32], strides = [1, 1]} : vector<8x128xf32> to vector<8x32xf32>
    %168 = arith.mulf %165, %103 : vector<8x32xf32>
    %169 = arith.mulf %164, %167 : vector<8x32xf32>
    %170 = arith.addf %168, %169 : vector<8x32xf32>
    %171 = math.tanh %170 : vector<8x32xf32>
    %172 = arith.mulf %166, %171 : vector<8x32xf32>
    %173 = arith.truncf %149 : vector<8x32xf32> to vector<8x32xbf16>
    %cst_52 = arith.constant dense<0.000000e+00> : vector<8x128xf32>
    %174 = tpu.matmul %173, %7, %cst_52 {dimension_numbers = #tpu.dot_dimension_numbers<[1], [0], [0], [1], [0, 0, 1, 1], [], []>} : vector<8x32xbf16>, vector<32x128xbf16>, vector<8x128xf32> -> vector<8x128xf32>
    %175 = arith.addf %11, %174 : vector<8x128xf32>
    %176 = arith.truncf %128 : vector<8x32xf32> to vector<8x32xbf16>
    %cst_53 = arith.constant dense<0.000000e+00> : vector<8x128xf32>
    %177 = tpu.matmul %176, %8, %cst_53 {dimension_numbers = #tpu.dot_dimension_numbers<[1], [0], [0], [1], [0, 0, 1, 1], [], []>} : vector<8x32xbf16>, vector<32x128xbf16>, vector<8x128xf32> -> vector<8x128xf32>
    %178 = arith.addf %175, %177 : vector<8x128xf32>
    %cst_54 = arith.constant 5.000000e-01 : f32
    %179 = vector.broadcast %cst_54 : f32 to vector<8x128xf32>
    %180 = arith.mulf %179, %178 : vector<8x128xf32>
    %181 = math.tanh %180 : vector<8x128xf32>
    %cst_55 = arith.constant 5.000000e-01 : f32
    %182 = vector.broadcast %cst_55 : f32 to vector<8x128xf32>
    %183 = arith.mulf %182, %181 : vector<8x128xf32>
    %cst_56 = arith.constant 5.000000e-01 : f32
    %184 = vector.broadcast %cst_56 : f32 to vector<8x128xf32>
    %185 = arith.addf %183, %184 : vector<8x128xf32>
    %186 = math.tanh %178 : vector<8x128xf32>
    %187 = vector.extract_strided_slice %185 {offsets = [0, 0], sizes = [8, 32], strides = [1, 1]} : vector<8x128xf32> to vector<8x32xf32>
    %188 = vector.extract_strided_slice %185 {offsets = [0, 32], sizes = [8, 32], strides = [1, 1]} : vector<8x128xf32> to vector<8x32xf32>
    %189 = vector.extract_strided_slice %185 {offsets = [0, 96], sizes = [8, 32], strides = [1, 1]} : vector<8x128xf32> to vector<8x32xf32>
    %190 = vector.extract_strided_slice %186 {offsets = [0, 64], sizes = [8, 32], strides = [1, 1]} : vector<8x128xf32> to vector<8x32xf32>
    %191 = arith.mulf %188, %126 : vector<8x32xf32>
    %192 = arith.mulf %187, %190 : vector<8x32xf32>
    %193 = arith.addf %191, %192 : vector<8x32xf32>
    %194 = math.tanh %193 : vector<8x32xf32>
    %195 = arith.mulf %189, %194 : vector<8x32xf32>
    %196 = vector.extract_strided_slice %5 {offsets = [24, 0], sizes = [8, 128], strides = [1, 1]} : vector<64x128xf32> to vector<8x128xf32>
    %197 = arith.truncf %149 : vector<8x32xf32> to vector<8x32xbf16>
    %cst_57 = arith.constant dense<0.000000e+00> : vector<8x128xf32>
    %198 = tpu.matmul %197, %6, %cst_57 {dimension_numbers = #tpu.dot_dimension_numbers<[1], [0], [0], [1], [0, 0, 1, 1], [], []>} : vector<8x32xbf16>, vector<32x128xbf16>, vector<8x128xf32> -> vector<8x128xf32>
    %199 = arith.addf %196, %198 : vector<8x128xf32>
    %cst_58 = arith.constant 5.000000e-01 : f32
    %200 = vector.broadcast %cst_58 : f32 to vector<8x128xf32>
    %201 = arith.mulf %200, %199 : vector<8x128xf32>
    %202 = math.tanh %201 : vector<8x128xf32>
    %cst_59 = arith.constant 5.000000e-01 : f32
    %203 = vector.broadcast %cst_59 : f32 to vector<8x128xf32>
    %204 = arith.mulf %203, %202 : vector<8x128xf32>
    %cst_60 = arith.constant 5.000000e-01 : f32
    %205 = vector.broadcast %cst_60 : f32 to vector<8x128xf32>
    %206 = arith.addf %204, %205 : vector<8x128xf32>
    %207 = math.tanh %199 : vector<8x128xf32>
    %208 = vector.extract_strided_slice %206 {offsets = [0, 0], sizes = [8, 32], strides = [1, 1]} : vector<8x128xf32> to vector<8x32xf32>
    %209 = vector.extract_strided_slice %206 {offsets = [0, 32], sizes = [8, 32], strides = [1, 1]} : vector<8x128xf32> to vector<8x32xf32>
    %210 = vector.extract_strided_slice %206 {offsets = [0, 96], sizes = [8, 32], strides = [1, 1]} : vector<8x128xf32> to vector<8x32xf32>
    %211 = vector.extract_strided_slice %207 {offsets = [0, 64], sizes = [8, 32], strides = [1, 1]} : vector<8x128xf32> to vector<8x32xf32>
    %212 = arith.mulf %209, %147 : vector<8x32xf32>
    %213 = arith.mulf %208, %211 : vector<8x32xf32>
    %214 = arith.addf %212, %213 : vector<8x32xf32>
    %215 = math.tanh %214 : vector<8x32xf32>
    %216 = arith.mulf %210, %215 : vector<8x32xf32>
    %217 = arith.truncf %195 : vector<8x32xf32> to vector<8x32xbf16>
    %cst_61 = arith.constant dense<0.000000e+00> : vector<8x128xf32>
    %218 = tpu.matmul %217, %12, %cst_61 {dimension_numbers = #tpu.dot_dimension_numbers<[1], [0], [0], [1], [0, 0, 1, 1], [], []>} : vector<8x32xbf16>, vector<32x128xbf16>, vector<8x128xf32> -> vector<8x128xf32>
    %219 = arith.addf %16, %218 : vector<8x128xf32>
    %220 = arith.truncf %172 : vector<8x32xf32> to vector<8x32xbf16>
    %cst_62 = arith.constant dense<0.000000e+00> : vector<8x128xf32>
    %221 = tpu.matmul %220, %13, %cst_62 {dimension_numbers = #tpu.dot_dimension_numbers<[1], [0], [0], [1], [0, 0, 1, 1], [], []>} : vector<8x32xbf16>, vector<32x128xbf16>, vector<8x128xf32> -> vector<8x128xf32>
    %222 = arith.addf %219, %221 : vector<8x128xf32>
    %cst_63 = arith.constant 5.000000e-01 : f32
    %223 = vector.broadcast %cst_63 : f32 to vector<8x128xf32>
    %224 = arith.mulf %223, %222 : vector<8x128xf32>
    %225 = math.tanh %224 : vector<8x128xf32>
    %cst_64 = arith.constant 5.000000e-01 : f32
    %226 = vector.broadcast %cst_64 : f32 to vector<8x128xf32>
    %227 = arith.mulf %226, %225 : vector<8x128xf32>
    %cst_65 = arith.constant 5.000000e-01 : f32
    %228 = vector.broadcast %cst_65 : f32 to vector<8x128xf32>
    %229 = arith.addf %227, %228 : vector<8x128xf32>
    %230 = math.tanh %222 : vector<8x128xf32>
    %231 = vector.extract_strided_slice %229 {offsets = [0, 0], sizes = [8, 32], strides = [1, 1]} : vector<8x128xf32> to vector<8x32xf32>
    %232 = vector.extract_strided_slice %229 {offsets = [0, 32], sizes = [8, 32], strides = [1, 1]} : vector<8x128xf32> to vector<8x32xf32>
    %233 = vector.extract_strided_slice %229 {offsets = [0, 96], sizes = [8, 32], strides = [1, 1]} : vector<8x128xf32> to vector<8x32xf32>
    %234 = vector.extract_strided_slice %230 {offsets = [0, 64], sizes = [8, 32], strides = [1, 1]} : vector<8x128xf32> to vector<8x32xf32>
    %235 = arith.mulf %232, %170 : vector<8x32xf32>
    %236 = arith.mulf %231, %234 : vector<8x32xf32>
    %237 = arith.addf %235, %236 : vector<8x32xf32>
    %238 = math.tanh %237 : vector<8x32xf32>
    %239 = arith.mulf %233, %238 : vector<8x32xf32>
    %240 = arith.truncf %216 : vector<8x32xf32> to vector<8x32xbf16>
    %cst_66 = arith.constant dense<0.000000e+00> : vector<8x128xf32>
    %241 = tpu.matmul %240, %7, %cst_66 {dimension_numbers = #tpu.dot_dimension_numbers<[1], [0], [0], [1], [0, 0, 1, 1], [], []>} : vector<8x32xbf16>, vector<32x128xbf16>, vector<8x128xf32> -> vector<8x128xf32>
    %242 = arith.addf %11, %241 : vector<8x128xf32>
    %243 = arith.truncf %195 : vector<8x32xf32> to vector<8x32xbf16>
    %cst_67 = arith.constant dense<0.000000e+00> : vector<8x128xf32>
    %244 = tpu.matmul %243, %8, %cst_67 {dimension_numbers = #tpu.dot_dimension_numbers<[1], [0], [0], [1], [0, 0, 1, 1], [], []>} : vector<8x32xbf16>, vector<32x128xbf16>, vector<8x128xf32> -> vector<8x128xf32>
    %245 = arith.addf %242, %244 : vector<8x128xf32>
    %cst_68 = arith.constant 5.000000e-01 : f32
    %246 = vector.broadcast %cst_68 : f32 to vector<8x128xf32>
    %247 = arith.mulf %246, %245 : vector<8x128xf32>
    %248 = math.tanh %247 : vector<8x128xf32>
    %cst_69 = arith.constant 5.000000e-01 : f32
    %249 = vector.broadcast %cst_69 : f32 to vector<8x128xf32>
    %250 = arith.mulf %249, %248 : vector<8x128xf32>
    %cst_70 = arith.constant 5.000000e-01 : f32
    %251 = vector.broadcast %cst_70 : f32 to vector<8x128xf32>
    %252 = arith.addf %250, %251 : vector<8x128xf32>
    %253 = math.tanh %245 : vector<8x128xf32>
    %254 = vector.extract_strided_slice %252 {offsets = [0, 0], sizes = [8, 32], strides = [1, 1]} : vector<8x128xf32> to vector<8x32xf32>
    %255 = vector.extract_strided_slice %252 {offsets = [0, 32], sizes = [8, 32], strides = [1, 1]} : vector<8x128xf32> to vector<8x32xf32>
    %256 = vector.extract_strided_slice %252 {offsets = [0, 96], sizes = [8, 32], strides = [1, 1]} : vector<8x128xf32> to vector<8x32xf32>
    %257 = vector.extract_strided_slice %253 {offsets = [0, 64], sizes = [8, 32], strides = [1, 1]} : vector<8x128xf32> to vector<8x32xf32>
    %258 = arith.mulf %255, %193 : vector<8x32xf32>
    %259 = arith.mulf %254, %257 : vector<8x32xf32>
    %260 = arith.addf %258, %259 : vector<8x32xf32>
    %261 = math.tanh %260 : vector<8x32xf32>
    %262 = arith.mulf %256, %261 : vector<8x32xf32>
    %263 = vector.extract_strided_slice %5 {offsets = [32, 0], sizes = [8, 128], strides = [1, 1]} : vector<64x128xf32> to vector<8x128xf32>
    %264 = arith.truncf %216 : vector<8x32xf32> to vector<8x32xbf16>
    %cst_71 = arith.constant dense<0.000000e+00> : vector<8x128xf32>
    %265 = tpu.matmul %264, %6, %cst_71 {dimension_numbers = #tpu.dot_dimension_numbers<[1], [0], [0], [1], [0, 0, 1, 1], [], []>} : vector<8x32xbf16>, vector<32x128xbf16>, vector<8x128xf32> -> vector<8x128xf32>
    %266 = arith.addf %263, %265 : vector<8x128xf32>
    %cst_72 = arith.constant 5.000000e-01 : f32
    %267 = vector.broadcast %cst_72 : f32 to vector<8x128xf32>
    %268 = arith.mulf %267, %266 : vector<8x128xf32>
    %269 = math.tanh %268 : vector<8x128xf32>
    %cst_73 = arith.constant 5.000000e-01 : f32
    %270 = vector.broadcast %cst_73 : f32 to vector<8x128xf32>
    %271 = arith.mulf %270, %269 : vector<8x128xf32>
    %cst_74 = arith.constant 5.000000e-01 : f32
    %272 = vector.broadcast %cst_74 : f32 to vector<8x128xf32>
    %273 = arith.addf %271, %272 : vector<8x128xf32>
    %274 = math.tanh %266 : vector<8x128xf32>
    %275 = vector.extract_strided_slice %273 {offsets = [0, 0], sizes = [8, 32], strides = [1, 1]} : vector<8x128xf32> to vector<8x32xf32>
    %276 = vector.extract_strided_slice %273 {offsets = [0, 32], sizes = [8, 32], strides = [1, 1]} : vector<8x128xf32> to vector<8x32xf32>
    %277 = vector.extract_strided_slice %273 {offsets = [0, 96], sizes = [8, 32], strides = [1, 1]} : vector<8x128xf32> to vector<8x32xf32>
    %278 = vector.extract_strided_slice %274 {offsets = [0, 64], sizes = [8, 32], strides = [1, 1]} : vector<8x128xf32> to vector<8x32xf32>
    %279 = arith.mulf %276, %214 : vector<8x32xf32>
    %280 = arith.mulf %275, %278 : vector<8x32xf32>
    %281 = arith.addf %279, %280 : vector<8x32xf32>
    %282 = math.tanh %281 : vector<8x32xf32>
    %283 = arith.mulf %277, %282 : vector<8x32xf32>
    %284 = arith.truncf %262 : vector<8x32xf32> to vector<8x32xbf16>
    %cst_75 = arith.constant dense<0.000000e+00> : vector<8x128xf32>
    %285 = tpu.matmul %284, %12, %cst_75 {dimension_numbers = #tpu.dot_dimension_numbers<[1], [0], [0], [1], [0, 0, 1, 1], [], []>} : vector<8x32xbf16>, vector<32x128xbf16>, vector<8x128xf32> -> vector<8x128xf32>
    %286 = arith.addf %16, %285 : vector<8x128xf32>
    %287 = arith.truncf %239 : vector<8x32xf32> to vector<8x32xbf16>
    %cst_76 = arith.constant dense<0.000000e+00> : vector<8x128xf32>
    %288 = tpu.matmul %287, %13, %cst_76 {dimension_numbers = #tpu.dot_dimension_numbers<[1], [0], [0], [1], [0, 0, 1, 1], [], []>} : vector<8x32xbf16>, vector<32x128xbf16>, vector<8x128xf32> -> vector<8x128xf32>
    %289 = arith.addf %286, %288 : vector<8x128xf32>
    %cst_77 = arith.constant 5.000000e-01 : f32
    %290 = vector.broadcast %cst_77 : f32 to vector<8x128xf32>
    %291 = arith.mulf %290, %289 : vector<8x128xf32>
    %292 = math.tanh %291 : vector<8x128xf32>
    %cst_78 = arith.constant 5.000000e-01 : f32
    %293 = vector.broadcast %cst_78 : f32 to vector<8x128xf32>
    %294 = arith.mulf %293, %292 : vector<8x128xf32>
    %cst_79 = arith.constant 5.000000e-01 : f32
    %295 = vector.broadcast %cst_79 : f32 to vector<8x128xf32>
    %296 = arith.addf %294, %295 : vector<8x128xf32>
    %297 = math.tanh %289 : vector<8x128xf32>
    %298 = vector.extract_strided_slice %296 {offsets = [0, 0], sizes = [8, 32], strides = [1, 1]} : vector<8x128xf32> to vector<8x32xf32>
    %299 = vector.extract_strided_slice %296 {offsets = [0, 32], sizes = [8, 32], strides = [1, 1]} : vector<8x128xf32> to vector<8x32xf32>
    %300 = vector.extract_strided_slice %296 {offsets = [0, 96], sizes = [8, 32], strides = [1, 1]} : vector<8x128xf32> to vector<8x32xf32>
    %301 = vector.extract_strided_slice %297 {offsets = [0, 64], sizes = [8, 32], strides = [1, 1]} : vector<8x128xf32> to vector<8x32xf32>
    %302 = arith.mulf %299, %237 : vector<8x32xf32>
    %303 = arith.mulf %298, %301 : vector<8x32xf32>
    %304 = arith.addf %302, %303 : vector<8x32xf32>
    %305 = math.tanh %304 : vector<8x32xf32>
    %306 = arith.mulf %300, %305 : vector<8x32xf32>
    %307 = arith.truncf %283 : vector<8x32xf32> to vector<8x32xbf16>
    %cst_80 = arith.constant dense<0.000000e+00> : vector<8x128xf32>
    %308 = tpu.matmul %307, %7, %cst_80 {dimension_numbers = #tpu.dot_dimension_numbers<[1], [0], [0], [1], [0, 0, 1, 1], [], []>} : vector<8x32xbf16>, vector<32x128xbf16>, vector<8x128xf32> -> vector<8x128xf32>
    %309 = arith.addf %11, %308 : vector<8x128xf32>
    %310 = arith.truncf %262 : vector<8x32xf32> to vector<8x32xbf16>
    %cst_81 = arith.constant dense<0.000000e+00> : vector<8x128xf32>
    %311 = tpu.matmul %310, %8, %cst_81 {dimension_numbers = #tpu.dot_dimension_numbers<[1], [0], [0], [1], [0, 0, 1, 1], [], []>} : vector<8x32xbf16>, vector<32x128xbf16>, vector<8x128xf32> -> vector<8x128xf32>
    %312 = arith.addf %309, %311 : vector<8x128xf32>
    %cst_82 = arith.constant 5.000000e-01 : f32
    %313 = vector.broadcast %cst_82 : f32 to vector<8x128xf32>
    %314 = arith.mulf %313, %312 : vector<8x128xf32>
    %315 = math.tanh %314 : vector<8x128xf32>
    %cst_83 = arith.constant 5.000000e-01 : f32
    %316 = vector.broadcast %cst_83 : f32 to vector<8x128xf32>
    %317 = arith.mulf %316, %315 : vector<8x128xf32>
    %cst_84 = arith.constant 5.000000e-01 : f32
    %318 = vector.broadcast %cst_84 : f32 to vector<8x128xf32>
    %319 = arith.addf %317, %318 : vector<8x128xf32>
    %320 = math.tanh %312 : vector<8x128xf32>
    %321 = vector.extract_strided_slice %319 {offsets = [0, 0], sizes = [8, 32], strides = [1, 1]} : vector<8x128xf32> to vector<8x32xf32>
    %322 = vector.extract_strided_slice %319 {offsets = [0, 32], sizes = [8, 32], strides = [1, 1]} : vector<8x128xf32> to vector<8x32xf32>
    %323 = vector.extract_strided_slice %319 {offsets = [0, 96], sizes = [8, 32], strides = [1, 1]} : vector<8x128xf32> to vector<8x32xf32>
    %324 = vector.extract_strided_slice %320 {offsets = [0, 64], sizes = [8, 32], strides = [1, 1]} : vector<8x128xf32> to vector<8x32xf32>
    %325 = arith.mulf %322, %260 : vector<8x32xf32>
    %326 = arith.mulf %321, %324 : vector<8x32xf32>
    %327 = arith.addf %325, %326 : vector<8x32xf32>
    %328 = math.tanh %327 : vector<8x32xf32>
    %329 = arith.mulf %323, %328 : vector<8x32xf32>
    %330 = vector.extract_strided_slice %5 {offsets = [40, 0], sizes = [8, 128], strides = [1, 1]} : vector<64x128xf32> to vector<8x128xf32>
    %331 = arith.truncf %283 : vector<8x32xf32> to vector<8x32xbf16>
    %cst_85 = arith.constant dense<0.000000e+00> : vector<8x128xf32>
    %332 = tpu.matmul %331, %6, %cst_85 {dimension_numbers = #tpu.dot_dimension_numbers<[1], [0], [0], [1], [0, 0, 1, 1], [], []>} : vector<8x32xbf16>, vector<32x128xbf16>, vector<8x128xf32> -> vector<8x128xf32>
    %333 = arith.addf %330, %332 : vector<8x128xf32>
    %cst_86 = arith.constant 5.000000e-01 : f32
    %334 = vector.broadcast %cst_86 : f32 to vector<8x128xf32>
    %335 = arith.mulf %334, %333 : vector<8x128xf32>
    %336 = math.tanh %335 : vector<8x128xf32>
    %cst_87 = arith.constant 5.000000e-01 : f32
    %337 = vector.broadcast %cst_87 : f32 to vector<8x128xf32>
    %338 = arith.mulf %337, %336 : vector<8x128xf32>
    %cst_88 = arith.constant 5.000000e-01 : f32
    %339 = vector.broadcast %cst_88 : f32 to vector<8x128xf32>
    %340 = arith.addf %338, %339 : vector<8x128xf32>
    %341 = math.tanh %333 : vector<8x128xf32>
    %342 = vector.extract_strided_slice %340 {offsets = [0, 0], sizes = [8, 32], strides = [1, 1]} : vector<8x128xf32> to vector<8x32xf32>
    %343 = vector.extract_strided_slice %340 {offsets = [0, 32], sizes = [8, 32], strides = [1, 1]} : vector<8x128xf32> to vector<8x32xf32>
    %344 = vector.extract_strided_slice %340 {offsets = [0, 96], sizes = [8, 32], strides = [1, 1]} : vector<8x128xf32> to vector<8x32xf32>
    %345 = vector.extract_strided_slice %341 {offsets = [0, 64], sizes = [8, 32], strides = [1, 1]} : vector<8x128xf32> to vector<8x32xf32>
    %346 = arith.mulf %343, %281 : vector<8x32xf32>
    %347 = arith.mulf %342, %345 : vector<8x32xf32>
    %348 = arith.addf %346, %347 : vector<8x32xf32>
    %349 = math.tanh %348 : vector<8x32xf32>
    %350 = arith.mulf %344, %349 : vector<8x32xf32>
    %351 = arith.truncf %329 : vector<8x32xf32> to vector<8x32xbf16>
    %cst_89 = arith.constant dense<0.000000e+00> : vector<8x128xf32>
    %352 = tpu.matmul %351, %12, %cst_89 {dimension_numbers = #tpu.dot_dimension_numbers<[1], [0], [0], [1], [0, 0, 1, 1], [], []>} : vector<8x32xbf16>, vector<32x128xbf16>, vector<8x128xf32> -> vector<8x128xf32>
    %353 = arith.addf %16, %352 : vector<8x128xf32>
    %354 = arith.truncf %306 : vector<8x32xf32> to vector<8x32xbf16>
    %cst_90 = arith.constant dense<0.000000e+00> : vector<8x128xf32>
    %355 = tpu.matmul %354, %13, %cst_90 {dimension_numbers = #tpu.dot_dimension_numbers<[1], [0], [0], [1], [0, 0, 1, 1], [], []>} : vector<8x32xbf16>, vector<32x128xbf16>, vector<8x128xf32> -> vector<8x128xf32>
    %356 = arith.addf %353, %355 : vector<8x128xf32>
    %cst_91 = arith.constant 5.000000e-01 : f32
    %357 = vector.broadcast %cst_91 : f32 to vector<8x128xf32>
    %358 = arith.mulf %357, %356 : vector<8x128xf32>
    %359 = math.tanh %358 : vector<8x128xf32>
    %cst_92 = arith.constant 5.000000e-01 : f32
    %360 = vector.broadcast %cst_92 : f32 to vector<8x128xf32>
    %361 = arith.mulf %360, %359 : vector<8x128xf32>
    %cst_93 = arith.constant 5.000000e-01 : f32
    %362 = vector.broadcast %cst_93 : f32 to vector<8x128xf32>
    %363 = arith.addf %361, %362 : vector<8x128xf32>
    %364 = math.tanh %356 : vector<8x128xf32>
    %365 = vector.extract_strided_slice %363 {offsets = [0, 0], sizes = [8, 32], strides = [1, 1]} : vector<8x128xf32> to vector<8x32xf32>
    %366 = vector.extract_strided_slice %363 {offsets = [0, 32], sizes = [8, 32], strides = [1, 1]} : vector<8x128xf32> to vector<8x32xf32>
    %367 = vector.extract_strided_slice %363 {offsets = [0, 96], sizes = [8, 32], strides = [1, 1]} : vector<8x128xf32> to vector<8x32xf32>
    %368 = vector.extract_strided_slice %364 {offsets = [0, 64], sizes = [8, 32], strides = [1, 1]} : vector<8x128xf32> to vector<8x32xf32>
    %369 = arith.mulf %366, %304 : vector<8x32xf32>
    %370 = arith.mulf %365, %368 : vector<8x32xf32>
    %371 = arith.addf %369, %370 : vector<8x32xf32>
    %372 = math.tanh %371 : vector<8x32xf32>
    %373 = arith.mulf %367, %372 : vector<8x32xf32>
    %374 = arith.truncf %350 : vector<8x32xf32> to vector<8x32xbf16>
    %cst_94 = arith.constant dense<0.000000e+00> : vector<8x128xf32>
    %375 = tpu.matmul %374, %7, %cst_94 {dimension_numbers = #tpu.dot_dimension_numbers<[1], [0], [0], [1], [0, 0, 1, 1], [], []>} : vector<8x32xbf16>, vector<32x128xbf16>, vector<8x128xf32> -> vector<8x128xf32>
    %376 = arith.addf %11, %375 : vector<8x128xf32>
    %377 = arith.truncf %329 : vector<8x32xf32> to vector<8x32xbf16>
    %cst_95 = arith.constant dense<0.000000e+00> : vector<8x128xf32>
    %378 = tpu.matmul %377, %8, %cst_95 {dimension_numbers = #tpu.dot_dimension_numbers<[1], [0], [0], [1], [0, 0, 1, 1], [], []>} : vector<8x32xbf16>, vector<32x128xbf16>, vector<8x128xf32> -> vector<8x128xf32>
    %379 = arith.addf %376, %378 : vector<8x128xf32>
    %cst_96 = arith.constant 5.000000e-01 : f32
    %380 = vector.broadcast %cst_96 : f32 to vector<8x128xf32>
    %381 = arith.mulf %380, %379 : vector<8x128xf32>
    %382 = math.tanh %381 : vector<8x128xf32>
    %cst_97 = arith.constant 5.000000e-01 : f32
    %383 = vector.broadcast %cst_97 : f32 to vector<8x128xf32>
    %384 = arith.mulf %383, %382 : vector<8x128xf32>
    %cst_98 = arith.constant 5.000000e-01 : f32
    %385 = vector.broadcast %cst_98 : f32 to vector<8x128xf32>
    %386 = arith.addf %384, %385 : vector<8x128xf32>
    %387 = math.tanh %379 : vector<8x128xf32>
    %388 = vector.extract_strided_slice %386 {offsets = [0, 0], sizes = [8, 32], strides = [1, 1]} : vector<8x128xf32> to vector<8x32xf32>
    %389 = vector.extract_strided_slice %386 {offsets = [0, 32], sizes = [8, 32], strides = [1, 1]} : vector<8x128xf32> to vector<8x32xf32>
    %390 = vector.extract_strided_slice %386 {offsets = [0, 96], sizes = [8, 32], strides = [1, 1]} : vector<8x128xf32> to vector<8x32xf32>
    %391 = vector.extract_strided_slice %387 {offsets = [0, 64], sizes = [8, 32], strides = [1, 1]} : vector<8x128xf32> to vector<8x32xf32>
    %392 = arith.mulf %389, %327 : vector<8x32xf32>
    %393 = arith.mulf %388, %391 : vector<8x32xf32>
    %394 = arith.addf %392, %393 : vector<8x32xf32>
    %395 = math.tanh %394 : vector<8x32xf32>
    %396 = arith.mulf %390, %395 : vector<8x32xf32>
    %397 = vector.extract_strided_slice %5 {offsets = [48, 0], sizes = [8, 128], strides = [1, 1]} : vector<64x128xf32> to vector<8x128xf32>
    %398 = arith.truncf %350 : vector<8x32xf32> to vector<8x32xbf16>
    %cst_99 = arith.constant dense<0.000000e+00> : vector<8x128xf32>
    %399 = tpu.matmul %398, %6, %cst_99 {dimension_numbers = #tpu.dot_dimension_numbers<[1], [0], [0], [1], [0, 0, 1, 1], [], []>} : vector<8x32xbf16>, vector<32x128xbf16>, vector<8x128xf32> -> vector<8x128xf32>
    %400 = arith.addf %397, %399 : vector<8x128xf32>
    %cst_100 = arith.constant 5.000000e-01 : f32
    %401 = vector.broadcast %cst_100 : f32 to vector<8x128xf32>
    %402 = arith.mulf %401, %400 : vector<8x128xf32>
    %403 = math.tanh %402 : vector<8x128xf32>
    %cst_101 = arith.constant 5.000000e-01 : f32
    %404 = vector.broadcast %cst_101 : f32 to vector<8x128xf32>
    %405 = arith.mulf %404, %403 : vector<8x128xf32>
    %cst_102 = arith.constant 5.000000e-01 : f32
    %406 = vector.broadcast %cst_102 : f32 to vector<8x128xf32>
    %407 = arith.addf %405, %406 : vector<8x128xf32>
    %408 = math.tanh %400 : vector<8x128xf32>
    %409 = vector.extract_strided_slice %407 {offsets = [0, 0], sizes = [8, 32], strides = [1, 1]} : vector<8x128xf32> to vector<8x32xf32>
    %410 = vector.extract_strided_slice %407 {offsets = [0, 32], sizes = [8, 32], strides = [1, 1]} : vector<8x128xf32> to vector<8x32xf32>
    %411 = vector.extract_strided_slice %407 {offsets = [0, 96], sizes = [8, 32], strides = [1, 1]} : vector<8x128xf32> to vector<8x32xf32>
    %412 = vector.extract_strided_slice %408 {offsets = [0, 64], sizes = [8, 32], strides = [1, 1]} : vector<8x128xf32> to vector<8x32xf32>
    %413 = arith.mulf %410, %348 : vector<8x32xf32>
    %414 = arith.mulf %409, %412 : vector<8x32xf32>
    %415 = arith.addf %413, %414 : vector<8x32xf32>
    %416 = math.tanh %415 : vector<8x32xf32>
    %417 = arith.mulf %411, %416 : vector<8x32xf32>
    %418 = arith.truncf %396 : vector<8x32xf32> to vector<8x32xbf16>
    %cst_103 = arith.constant dense<0.000000e+00> : vector<8x128xf32>
    %419 = tpu.matmul %418, %12, %cst_103 {dimension_numbers = #tpu.dot_dimension_numbers<[1], [0], [0], [1], [0, 0, 1, 1], [], []>} : vector<8x32xbf16>, vector<32x128xbf16>, vector<8x128xf32> -> vector<8x128xf32>
    %420 = arith.addf %16, %419 : vector<8x128xf32>
    %421 = arith.truncf %373 : vector<8x32xf32> to vector<8x32xbf16>
    %cst_104 = arith.constant dense<0.000000e+00> : vector<8x128xf32>
    %422 = tpu.matmul %421, %13, %cst_104 {dimension_numbers = #tpu.dot_dimension_numbers<[1], [0], [0], [1], [0, 0, 1, 1], [], []>} : vector<8x32xbf16>, vector<32x128xbf16>, vector<8x128xf32> -> vector<8x128xf32>
    %423 = arith.addf %420, %422 : vector<8x128xf32>
    %cst_105 = arith.constant 5.000000e-01 : f32
    %424 = vector.broadcast %cst_105 : f32 to vector<8x128xf32>
    %425 = arith.mulf %424, %423 : vector<8x128xf32>
    %426 = math.tanh %425 : vector<8x128xf32>
    %cst_106 = arith.constant 5.000000e-01 : f32
    %427 = vector.broadcast %cst_106 : f32 to vector<8x128xf32>
    %428 = arith.mulf %427, %426 : vector<8x128xf32>
    %cst_107 = arith.constant 5.000000e-01 : f32
    %429 = vector.broadcast %cst_107 : f32 to vector<8x128xf32>
    %430 = arith.addf %428, %429 : vector<8x128xf32>
    %431 = math.tanh %423 : vector<8x128xf32>
    %432 = vector.extract_strided_slice %430 {offsets = [0, 0], sizes = [8, 32], strides = [1, 1]} : vector<8x128xf32> to vector<8x32xf32>
    %433 = vector.extract_strided_slice %430 {offsets = [0, 32], sizes = [8, 32], strides = [1, 1]} : vector<8x128xf32> to vector<8x32xf32>
    %434 = vector.extract_strided_slice %430 {offsets = [0, 96], sizes = [8, 32], strides = [1, 1]} : vector<8x128xf32> to vector<8x32xf32>
    %435 = vector.extract_strided_slice %431 {offsets = [0, 64], sizes = [8, 32], strides = [1, 1]} : vector<8x128xf32> to vector<8x32xf32>
    %436 = arith.mulf %433, %371 : vector<8x32xf32>
    %437 = arith.mulf %432, %435 : vector<8x32xf32>
    %438 = arith.addf %436, %437 : vector<8x32xf32>
    %439 = math.tanh %438 : vector<8x32xf32>
    %440 = arith.mulf %434, %439 : vector<8x32xf32>
    %441 = arith.truncf %417 : vector<8x32xf32> to vector<8x32xbf16>
    %cst_108 = arith.constant dense<0.000000e+00> : vector<8x128xf32>
    %442 = tpu.matmul %441, %7, %cst_108 {dimension_numbers = #tpu.dot_dimension_numbers<[1], [0], [0], [1], [0, 0, 1, 1], [], []>} : vector<8x32xbf16>, vector<32x128xbf16>, vector<8x128xf32> -> vector<8x128xf32>
    %443 = arith.addf %11, %442 : vector<8x128xf32>
    %444 = arith.truncf %396 : vector<8x32xf32> to vector<8x32xbf16>
    %cst_109 = arith.constant dense<0.000000e+00> : vector<8x128xf32>
    %445 = tpu.matmul %444, %8, %cst_109 {dimension_numbers = #tpu.dot_dimension_numbers<[1], [0], [0], [1], [0, 0, 1, 1], [], []>} : vector<8x32xbf16>, vector<32x128xbf16>, vector<8x128xf32> -> vector<8x128xf32>
    %446 = arith.addf %443, %445 : vector<8x128xf32>
    %cst_110 = arith.constant 5.000000e-01 : f32
    %447 = vector.broadcast %cst_110 : f32 to vector<8x128xf32>
    %448 = arith.mulf %447, %446 : vector<8x128xf32>
    %449 = math.tanh %448 : vector<8x128xf32>
    %cst_111 = arith.constant 5.000000e-01 : f32
    %450 = vector.broadcast %cst_111 : f32 to vector<8x128xf32>
    %451 = arith.mulf %450, %449 : vector<8x128xf32>
    %cst_112 = arith.constant 5.000000e-01 : f32
    %452 = vector.broadcast %cst_112 : f32 to vector<8x128xf32>
    %453 = arith.addf %451, %452 : vector<8x128xf32>
    %454 = math.tanh %446 : vector<8x128xf32>
    %455 = vector.extract_strided_slice %453 {offsets = [0, 0], sizes = [8, 32], strides = [1, 1]} : vector<8x128xf32> to vector<8x32xf32>
    %456 = vector.extract_strided_slice %453 {offsets = [0, 32], sizes = [8, 32], strides = [1, 1]} : vector<8x128xf32> to vector<8x32xf32>
    %457 = vector.extract_strided_slice %453 {offsets = [0, 96], sizes = [8, 32], strides = [1, 1]} : vector<8x128xf32> to vector<8x32xf32>
    %458 = vector.extract_strided_slice %454 {offsets = [0, 64], sizes = [8, 32], strides = [1, 1]} : vector<8x128xf32> to vector<8x32xf32>
    %459 = arith.mulf %456, %394 : vector<8x32xf32>
    %460 = arith.mulf %455, %458 : vector<8x32xf32>
    %461 = arith.addf %459, %460 : vector<8x32xf32>
    %462 = math.tanh %461 : vector<8x32xf32>
    %463 = arith.mulf %457, %462 : vector<8x32xf32>
    %464 = vector.extract_strided_slice %5 {offsets = [56, 0], sizes = [8, 128], strides = [1, 1]} : vector<64x128xf32> to vector<8x128xf32>
    %465 = arith.truncf %417 : vector<8x32xf32> to vector<8x32xbf16>
    %cst_113 = arith.constant dense<0.000000e+00> : vector<8x128xf32>
    %466 = tpu.matmul %465, %6, %cst_113 {dimension_numbers = #tpu.dot_dimension_numbers<[1], [0], [0], [1], [0, 0, 1, 1], [], []>} : vector<8x32xbf16>, vector<32x128xbf16>, vector<8x128xf32> -> vector<8x128xf32>
    %467 = arith.addf %464, %466 : vector<8x128xf32>
    %cst_114 = arith.constant 5.000000e-01 : f32
    %468 = vector.broadcast %cst_114 : f32 to vector<8x128xf32>
    %469 = arith.mulf %468, %467 : vector<8x128xf32>
    %470 = math.tanh %469 : vector<8x128xf32>
    %cst_115 = arith.constant 5.000000e-01 : f32
    %471 = vector.broadcast %cst_115 : f32 to vector<8x128xf32>
    %472 = arith.mulf %471, %470 : vector<8x128xf32>
    %cst_116 = arith.constant 5.000000e-01 : f32
    %473 = vector.broadcast %cst_116 : f32 to vector<8x128xf32>
    %474 = arith.addf %472, %473 : vector<8x128xf32>
    %475 = math.tanh %467 : vector<8x128xf32>
    %476 = vector.extract_strided_slice %474 {offsets = [0, 0], sizes = [8, 32], strides = [1, 1]} : vector<8x128xf32> to vector<8x32xf32>
    %477 = vector.extract_strided_slice %474 {offsets = [0, 32], sizes = [8, 32], strides = [1, 1]} : vector<8x128xf32> to vector<8x32xf32>
    %478 = vector.extract_strided_slice %474 {offsets = [0, 96], sizes = [8, 32], strides = [1, 1]} : vector<8x128xf32> to vector<8x32xf32>
    %479 = vector.extract_strided_slice %475 {offsets = [0, 64], sizes = [8, 32], strides = [1, 1]} : vector<8x128xf32> to vector<8x32xf32>
    %480 = arith.mulf %477, %415 : vector<8x32xf32>
    %481 = arith.mulf %476, %479 : vector<8x32xf32>
    %482 = arith.addf %480, %481 : vector<8x32xf32>
    %483 = math.tanh %482 : vector<8x32xf32>
    %484 = arith.mulf %478, %483 : vector<8x32xf32>
    %485 = arith.truncf %463 : vector<8x32xf32> to vector<8x32xbf16>
    %cst_117 = arith.constant dense<0.000000e+00> : vector<8x128xf32>
    %486 = tpu.matmul %485, %12, %cst_117 {dimension_numbers = #tpu.dot_dimension_numbers<[1], [0], [0], [1], [0, 0, 1, 1], [], []>} : vector<8x32xbf16>, vector<32x128xbf16>, vector<8x128xf32> -> vector<8x128xf32>
    %487 = arith.addf %16, %486 : vector<8x128xf32>
    %488 = arith.truncf %440 : vector<8x32xf32> to vector<8x32xbf16>
    %cst_118 = arith.constant dense<0.000000e+00> : vector<8x128xf32>
    %489 = tpu.matmul %488, %13, %cst_118 {dimension_numbers = #tpu.dot_dimension_numbers<[1], [0], [0], [1], [0, 0, 1, 1], [], []>} : vector<8x32xbf16>, vector<32x128xbf16>, vector<8x128xf32> -> vector<8x128xf32>
    %490 = arith.addf %487, %489 : vector<8x128xf32>
    %cst_119 = arith.constant 5.000000e-01 : f32
    %491 = vector.broadcast %cst_119 : f32 to vector<8x128xf32>
    %492 = arith.mulf %491, %490 : vector<8x128xf32>
    %493 = math.tanh %492 : vector<8x128xf32>
    %cst_120 = arith.constant 5.000000e-01 : f32
    %494 = vector.broadcast %cst_120 : f32 to vector<8x128xf32>
    %495 = arith.mulf %494, %493 : vector<8x128xf32>
    %cst_121 = arith.constant 5.000000e-01 : f32
    %496 = vector.broadcast %cst_121 : f32 to vector<8x128xf32>
    %497 = arith.addf %495, %496 : vector<8x128xf32>
    %498 = math.tanh %490 : vector<8x128xf32>
    %499 = vector.extract_strided_slice %497 {offsets = [0, 0], sizes = [8, 32], strides = [1, 1]} : vector<8x128xf32> to vector<8x32xf32>
    %500 = vector.extract_strided_slice %497 {offsets = [0, 32], sizes = [8, 32], strides = [1, 1]} : vector<8x128xf32> to vector<8x32xf32>
    %501 = vector.extract_strided_slice %497 {offsets = [0, 96], sizes = [8, 32], strides = [1, 1]} : vector<8x128xf32> to vector<8x32xf32>
    %502 = vector.extract_strided_slice %498 {offsets = [0, 64], sizes = [8, 32], strides = [1, 1]} : vector<8x128xf32> to vector<8x32xf32>
    %503 = arith.mulf %500, %438 : vector<8x32xf32>
    %504 = arith.mulf %499, %502 : vector<8x32xf32>
    %505 = arith.addf %503, %504 : vector<8x32xf32>
    %506 = math.tanh %505 : vector<8x32xf32>
    %507 = arith.mulf %501, %506 : vector<8x32xf32>
    %508 = arith.truncf %484 : vector<8x32xf32> to vector<8x32xbf16>
    %cst_122 = arith.constant dense<0.000000e+00> : vector<8x128xf32>
    %509 = tpu.matmul %508, %7, %cst_122 {dimension_numbers = #tpu.dot_dimension_numbers<[1], [0], [0], [1], [0, 0, 1, 1], [], []>} : vector<8x32xbf16>, vector<32x128xbf16>, vector<8x128xf32> -> vector<8x128xf32>
    %510 = arith.addf %11, %509 : vector<8x128xf32>
    %511 = arith.truncf %463 : vector<8x32xf32> to vector<8x32xbf16>
    %cst_123 = arith.constant dense<0.000000e+00> : vector<8x128xf32>
    %512 = tpu.matmul %511, %8, %cst_123 {dimension_numbers = #tpu.dot_dimension_numbers<[1], [0], [0], [1], [0, 0, 1, 1], [], []>} : vector<8x32xbf16>, vector<32x128xbf16>, vector<8x128xf32> -> vector<8x128xf32>
    %513 = arith.addf %510, %512 : vector<8x128xf32>
    %cst_124 = arith.constant 5.000000e-01 : f32
    %514 = vector.broadcast %cst_124 : f32 to vector<8x128xf32>
    %515 = arith.mulf %514, %513 : vector<8x128xf32>
    %516 = math.tanh %515 : vector<8x128xf32>
    %cst_125 = arith.constant 5.000000e-01 : f32
    %517 = vector.broadcast %cst_125 : f32 to vector<8x128xf32>
    %518 = arith.mulf %517, %516 : vector<8x128xf32>
    %cst_126 = arith.constant 5.000000e-01 : f32
    %519 = vector.broadcast %cst_126 : f32 to vector<8x128xf32>
    %520 = arith.addf %518, %519 : vector<8x128xf32>
    %521 = math.tanh %513 : vector<8x128xf32>
    %522 = vector.extract_strided_slice %520 {offsets = [0, 0], sizes = [8, 32], strides = [1, 1]} : vector<8x128xf32> to vector<8x32xf32>
    %523 = vector.extract_strided_slice %520 {offsets = [0, 32], sizes = [8, 32], strides = [1, 1]} : vector<8x128xf32> to vector<8x32xf32>
    %524 = vector.extract_strided_slice %520 {offsets = [0, 96], sizes = [8, 32], strides = [1, 1]} : vector<8x128xf32> to vector<8x32xf32>
    %525 = vector.extract_strided_slice %521 {offsets = [0, 64], sizes = [8, 32], strides = [1, 1]} : vector<8x128xf32> to vector<8x32xf32>
    %526 = arith.mulf %523, %461 : vector<8x32xf32>
    %527 = arith.mulf %522, %525 : vector<8x32xf32>
    %528 = arith.addf %526, %527 : vector<8x32xf32>
    %529 = math.tanh %528 : vector<8x32xf32>
    %530 = arith.mulf %524, %529 : vector<8x32xf32>
    %531 = arith.truncf %530 : vector<8x32xf32> to vector<8x32xbf16>
    %cst_127 = arith.constant dense<0.000000e+00> : vector<8x128xf32>
    %532 = tpu.matmul %531, %12, %cst_127 {dimension_numbers = #tpu.dot_dimension_numbers<[1], [0], [0], [1], [0, 0, 1, 1], [], []>} : vector<8x32xbf16>, vector<32x128xbf16>, vector<8x128xf32> -> vector<8x128xf32>
    %533 = arith.addf %16, %532 : vector<8x128xf32>
    %534 = arith.truncf %507 : vector<8x32xf32> to vector<8x32xbf16>
    %cst_128 = arith.constant dense<0.000000e+00> : vector<8x128xf32>
    %535 = tpu.matmul %534, %13, %cst_128 {dimension_numbers = #tpu.dot_dimension_numbers<[1], [0], [0], [1], [0, 0, 1, 1], [], []>} : vector<8x32xbf16>, vector<32x128xbf16>, vector<8x128xf32> -> vector<8x128xf32>
    %536 = arith.addf %533, %535 : vector<8x128xf32>
    %cst_129 = arith.constant 5.000000e-01 : f32
    %537 = vector.broadcast %cst_129 : f32 to vector<8x128xf32>
    %538 = arith.mulf %537, %536 : vector<8x128xf32>
    %539 = math.tanh %538 : vector<8x128xf32>
    %cst_130 = arith.constant 5.000000e-01 : f32
    %540 = vector.broadcast %cst_130 : f32 to vector<8x128xf32>
    %541 = arith.mulf %540, %539 : vector<8x128xf32>
    %cst_131 = arith.constant 5.000000e-01 : f32
    %542 = vector.broadcast %cst_131 : f32 to vector<8x128xf32>
    %543 = arith.addf %541, %542 : vector<8x128xf32>
    %544 = math.tanh %536 : vector<8x128xf32>
    %545 = vector.extract_strided_slice %543 {offsets = [0, 0], sizes = [8, 32], strides = [1, 1]} : vector<8x128xf32> to vector<8x32xf32>
    %546 = vector.extract_strided_slice %543 {offsets = [0, 32], sizes = [8, 32], strides = [1, 1]} : vector<8x128xf32> to vector<8x32xf32>
    %547 = vector.extract_strided_slice %543 {offsets = [0, 96], sizes = [8, 32], strides = [1, 1]} : vector<8x128xf32> to vector<8x32xf32>
    %548 = vector.extract_strided_slice %544 {offsets = [0, 64], sizes = [8, 32], strides = [1, 1]} : vector<8x128xf32> to vector<8x32xf32>
    %549 = arith.mulf %546, %505 : vector<8x32xf32>
    %550 = arith.mulf %545, %548 : vector<8x32xf32>
    %551 = arith.addf %549, %550 : vector<8x32xf32>
    %552 = math.tanh %551 : vector<8x32xf32>
    %553 = arith.mulf %547, %552 : vector<8x32xf32>
    %554 = arith.addf %553, %530 : vector<8x32xf32>
    %cst_132 = arith.constant 0.000000e+00 : f32
    %555 = vector.broadcast %cst_132 : f32 to vector<8x32xf32>
    %556 = arith.maximumf %554, %555 : vector<8x32xf32>
    %c0_133 = arith.constant 0 : index
    %c0_134 = arith.constant 0 : index
    %557 = vector.load %arg10[%c0_133, %c0_134] : memref<32x16xf32, #tpu.memory_space<vmem>>, vector<32x16xf32>
    %cst_135 = arith.constant dense<0.000000e+00> : vector<8x16xf32>
    %558 = tpu.matmul %556, %557, %cst_135 {dimension_numbers = #tpu.dot_dimension_numbers<[1], [0], [0], [1], [0, 0, 1, 1], [], []>} : vector<8x32xf32>, vector<32x16xf32>, vector<8x16xf32> -> vector<8x16xf32>
    %c0_136 = arith.constant 0 : index
    %c0_137 = arith.constant 0 : index
    %559 = vector.load %arg11[%c0_136, %c0_137] : memref<1x16xf32, #tpu.memory_space<vmem>>, vector<1x16xf32>
    %560 = vector.broadcast %559 : vector<1x16xf32> to vector<8x16xf32>
    %561 = arith.addf %558, %560 : vector<8x16xf32>
    %cst_138 = arith.constant 0.000000e+00 : f32
    %562 = vector.broadcast %cst_138 : f32 to vector<8x16xf32>
    %563 = arith.maximumf %561, %562 : vector<8x16xf32>
    %c0_139 = arith.constant 0 : index
    %c0_140 = arith.constant 0 : index
    %564 = vector.load %arg12[%c0_139, %c0_140] : memref<16x8xf32, #tpu.memory_space<vmem>>, vector<16x8xf32>
    %cst_141 = arith.constant dense<0.000000e+00> : vector<8x8xf32>
    %565 = tpu.matmul %563, %564, %cst_141 {dimension_numbers = #tpu.dot_dimension_numbers<[1], [0], [0], [1], [0, 0, 1, 1], [], []>} : vector<8x16xf32>, vector<16x8xf32>, vector<8x8xf32> -> vector<8x8xf32>
    %c0_142 = arith.constant 0 : index
    %c0_143 = arith.constant 0 : index
    %566 = vector.load %arg13[%c0_142, %c0_143] : memref<1x8xf32, #tpu.memory_space<vmem>>, vector<1x8xf32>
    %567 = vector.broadcast %566 : vector<1x8xf32> to vector<8x8xf32>
    %568 = arith.addf %565, %567 : vector<8x8xf32>
    %cst_144 = arith.constant 0.000000e+00 : f32
    %569 = vector.broadcast %cst_144 : f32 to vector<8x8xf32>
    %570 = arith.maximumf %568, %569 : vector<8x8xf32>
    %c0_145 = arith.constant 0 : index
    %c0_146 = arith.constant 0 : index
    %571 = vector.load %arg14[%c0_145, %c0_146] : memref<8x1xf32, #tpu.memory_space<vmem>>, vector<8x1xf32>
    %cst_147 = arith.constant dense<0.000000e+00> : vector<8x1xf32>
    %572 = tpu.matmul %570, %571, %cst_147 {dimension_numbers = #tpu.dot_dimension_numbers<[1], [0], [0], [1], [0, 0, 1, 1], [], []>} : vector<8x8xf32>, vector<8x1xf32>, vector<8x1xf32> -> vector<8x1xf32>
    %c0_148 = arith.constant 0 : index
    %c0_149 = arith.constant 0 : index
    %573 = vector.load %arg15[%c0_148, %c0_149] : memref<1x1xf32, #tpu.memory_space<vmem>>, vector<1x1xf32>
    %574 = vector.broadcast %573 : vector<1x1xf32> to vector<8x1xf32>
    %575 = arith.addf %572, %574 : vector<8x1xf32>
    %c0_150 = arith.constant 0 : index
    %c0_151 = arith.constant 0 : index
    %576 = vector.load %arg16[%c0_150, %c0_151] : memref<8x1xf32, #tpu.memory_space<vmem>>, vector<8x1xf32>
    tpu.vector_store %arg16[%c0_150, %c0_151], %575 {strides = array<i32>} : memref<8x1xf32, #tpu.memory_space<vmem>>, vector<8x1xf32>,
    return
  }
}

</mosaic_0001>

<bundles_post_ra>
// kernel: tpu_custom_call.1
= control target key start
LH: loop header
LB: loop body
LE: loop exit
PB: predicated region body
PF: predicated region fallthrough
CT: control target
= control target key end

     0   :  { %vm105_vm0 = vcmask 1041408   ;;  %vm92_vm1 = vcmask 31744   ;;  %v3591_v1 = vmov 0.0   ;;  %vm3592_vm2 = vmmov 0   ;;  %s3594_s19 = smov 64   ;;  %s3595_s20 = smov 32   ;;  %s4375_s1 = inlined_call_operand.vmem [shape: bf16[4,128], index: 1, kind: input, shape index: {}]   ;;  %s4376_s2 = inlined_call_operand.vmem [shape: bf16[32,128], index: 2, kind: input, shape index: {}]   ;;  %s4377_s0 = inlined_call_operand.vmem [shape: bf16[64,4], index: 0, kind: input, shape index: {}]   ;;  %s4378_s3 = inlined_call_operand.vmem [shape: f32[1,128], index: 3, kind: input, shape index: {}]   ;;  %s4379_s5 = inlined_call_operand.vmem [shape: bf16[32,128], index: 5, kind: input, shape index: {}]   ;;  %s4380_s4 = inlined_call_operand.vmem [shape: bf16[32,128], index: 4, kind: input, shape index: {}]   ;;  %s4381_s6 = inlined_call_operand.vmem [shape: f32[1,128], index: 6, kind: input, shape index: {}]   ;;  %s4382_s8 = inlined_call_operand.vmem [shape: bf16[32,128], index: 8, kind: input, shape index: {}]   ;;  %s4383_s7 = inlined_call_operand.vmem [shape: bf16[32,128], index: 7, kind: input, shape index: {}]   ;;  %s4384_s9 = inlined_call_operand.vmem [shape: f32[1,128], index: 9, kind: input, shape index: {}]   ;;  %s4385_s10 = inlined_call_operand.vmem [shape: f32[32,16], index: 10, kind: input, shape index: {}]   ;;  %s4386_s12 = inlined_call_operand.vmem [shape: f32[16,8], index: 12, kind: input, shape index: {}]   ;;  %s4387_s14 = inlined_call_operand.vmem [shape: f32[8,1], index: 14, kind: input, shape index: {}]   ;;  %s4388_s11 = inlined_call_operand.vmem [shape: f32[1,16], index: 11, kind: input, shape index: {}]   ;;  %s4389_s15 = inlined_call_operand.<no memory space> [shape: f32[1,1], index: 15, kind: input, shape index: {}]   ;;  %s4390_s13 = inlined_call_operand.vmem [shape: f32[1,8], index: 13, kind: input, shape index: {}]   ;;  %s4391_s16 = inlined_call_operand.vmem [shape: f32[8,1], index: 16, kind: output, shape index: {}]  }
   0x1   :  { %4392 = sst [smem:[#allocation3_spill]] %s4375_s1  ;;  %3071 = vmatprep.subr.bf16.mxu1 %v3591_v1  ;;  %3075 = vmatprep.mubr.msk.bf16.mxu1 %vm3592_vm2, %v3591_v1  ;;  %v3690_v3 = vld [vmem:[%s4376_s2 + $0x8] sm:$0xff]   ;;  %v3421_v4 = vld [vmem:[%s4377_s0] sm:$0xff]   ;;  %v3593_v7 = vmov 0   ;;  %v3425_v27 = vld [vmem:[%s4377_s0 + $0x10] sm:$0xff]   ;;  %vm220_vm3 = vcmask 261120  }
   0x2   :  { %s4393_s23 = sld [smem:[#allocation3_spill]]  ;;  %3072 = vmatpush3.bf16.msra.mxu1 %v3690_v3  ;;  %v3422_v5 = vld [vmem:[%s4377_s0 + $0x8] sm:$0xff]   ;;  %3063 = vmatprep.mubr.msk.bf16.mxu0 %vm92_vm1, %v3421_v4  ;;  %v3705_v6 = vld [vmem:[%s4376_s2] sm:$0xff]   ;;  %v3426_v28 = vld [vmem:[%s4377_s0 + $0x18] sm:$0xff]   ;;  %vm2699_vm4 = vcmask 130048   ;;  %vm2782_vm5 = vcmask 64512  }
   0x3   :  { %3073 = vmatprep.subr.bf16.mxu1 %v3591_v1  ;;  %v3718_v9 = vld [vmem:[%s4378_s3] ss:$0 sm:$0xff]  ;;  %v3735_v29 = vld [vmem:[%s4379_s5 + $0x8] sm:$0xff]   ;;  %vm2856_vm6 = vcmask 7168  }
   0x4   :  { %v3741_v30 = vld [vmem:[%s4380_s4 + $0x8] sm:$0xff]   ;;  %v3747_v31 = vld [vmem:[%s4379_s5] sm:$0xff]  }
   0x5   :  { %v3754_v32 = vld [vmem:[%s4380_s4] sm:$0xff]  }
   0x6   :  { %3074 = vmatpush3.bf16.msra.mxu1 %v3705_v6  ;;  %v3792_v48 = vld [vmem:[%s4381_s6] ss:$0 sm:$0xff] }
   0x7   :  { %3079 = vmatprep.subr.bf16.mxu1 %v3591_v1 }
   0x8   :  { %v64_v0 = vld [vmem:[%s4393_s23] sm:$0x3] }
   0x9   :  { %3414 = vmatprep.subr.msk.bf16.mxu0 %vm105_vm0, %v64_v0  ;;  %v107_v2 = vsel %vm105_vm0, %v64_v0, 0  ;;  %3076 = vmatmul.mubr.bf16.vlgmr.msra.gmra.mxu1 %v3593_v7 }
   0xa   :  { %3062 = vmatpush3.bf16.msra.mxu0 %v107_v2  ;;  %3083 = vmatprep.mubr.msk.bf16.mxu1 %vm3592_vm2, %v3591_v1 }
   0xb   :  { %3087 = vmatprep.subr.bf16.mxu0 %v3591_v1  ;;  %3080 = vmatpush3.bf16.msra.mxu1 %v3741_v30 }
   0xc   :  { %3081 = vmatprep.subr.bf16.mxu1 %v3591_v1 }
   0xd   :  { %3064 = vmatmul.mubr.msk.bf16.vlgmr.msra.gmra.mxu0 %vm92_vm1, %v3422_v5 }
   0xe   :  { %3067 = vmatprep.mubr.msk.bf16.mxu0 %vm92_vm1, %v3425_v27  ;;  %3088 = vmatpush3.bf16.msra.mxu0 %v3735_v29  ;;  %v3829_v27 = vld [vmem:[%s4383_s7] sm:$0xff]  }
   0xf   :  { %3089 = vmatprep.subr.bf16.mxu0 %v3591_v1  ;;  %3082 = vmatpush3.bf16.msra.mxu1 %v3754_v32 }
  0x10   :  { %3095 = vmatprep.subr.bf16.mxu1 %v3591_v1 }
  0x12   :  { %3090 = vmatpush3.bf16.msra.mxu0 %v3747_v31 }
  0x13   :  { %3103 = vmatprep.subr.bf16.mxu0 %v3591_v1 }
  0x15   :  { %3068 = vmatmul.mubr.msk.bf16.gmra.mxu0 %vm92_vm1, %v3426_v28 }
  0x16   :  { %3091 = vmatprep.mubr.msk.bf16.mxu0 %vm3592_vm2, %v3591_v1 }
  0x1d   :  { %3092 = vmatmul.mubr.bf16.vlgmr.msra.gmra.mxu0 %v3593_v7 }
  0x1e   :  { %3107 = vmatprep.mubr.msk.bf16.mxu0 %vm3592_vm2, %v3591_v1 }
  0xc9   :  { %v258_v12 = vpop.f32.mrf.mxu1 }
  0xcb   :  { %v3077_v14 = vpop.f32.mrf.mxu1 }
  0xcd   :  { %v3713_v8 = vpop.f32.mrf.mxu0  ;;  %v261_v15 = vpop.f32.mrf.mxu1 }
  0xcf   :  { %v143_v10 = vpop.f32.mrf.mxu0  ;;  %v3078_v16 = vpop.f32.mrf.mxu1 }
  0xd0   :  { %v144_v11 = vadd.f32 %v3718_v9, %v143_v10 }
  0xd1   :  { %v3769_v37 = vpop.f32.mrf.mxu0 }
  0xd2   :  { %v264_v13 = vadd.f32 %v258_v12, %v144_v11 }
  0xd3   :  { %v146_v38 = vpop.f32.mrf.mxu0 }
  0xd4   :  { %3434 = vtanh.f32 %v264_v13  ;;  %v265_v18 = vmul.f32 0.5, %v264_v13  ;;  %v147_v55 = vadd.f32 %v3718_v9, %v146_v38 }
  0xd5   :  { %v3771_v39 = vpop.f32.mrf.mxu0 }
  0xd6   :  { %3436 = vtanh.f32 %v265_v18 }
  0xd7   :  { %v3773_v40 = vpop.f32.mrf.mxu0 }
  0xd9   :  { %v3775_v41 = vpop.f32.mrf.mxu0 }
  0xdb   :  { %v3777_v42 = vpop.f32.mrf.mxu0 }
  0xdd   :  { %v393_v43 = vpop.f32.mrf.mxu0 }
  0xdf   :  { %v3093_v44 = vpop.f32.mrf.mxu0 }
  0xe1   :  { %v3435_v17 = vpop.eup %3434  ;;  %v396_v45 = vpop.f32.mrf.mxu0 }
  0xe2   :  { %272 = vrot.lane.b32.xlu0 %v3435_v17, %s3594_s19 }
  0xe3   :  { %v3437_v19 = vpop.eup %3436  ;;  %v3094_v46 = vpop.f32.mrf.mxu0 }
  0xe4   :  { %v267_v20 = vmul.f32 0.5, %v3437_v19 }
  0xe6   :  { %v268_v21 = vadd.f32 0.5, %v267_v20 }
  0xe8   :  { %v270_v24 = vmul.f32 0.0, %v268_v21 }
 0x154   :  { %v273_v22 = vpop.permute.xlu0 %272 }
 0x155   :  { %v275_v23 = vmul.f32 %v273_v22, %v268_v21 }
 0x157   :  { %277 = vrot.lane.b32.xlu0 %v275_v23, %s3595_s20  ;;  %v3810_v23 = vld [vmem:[%s4382_s8 + $0x8] sm:$0xff]  }
 0x1c9   :  { %v278_v25 = vpop.permute.xlu0 %277 }
 0x1ca   :  { %v3723_v26 = vadd.f32 %v278_v25, %v270_v24  ;;  %v3815_v25 = vld [vmem:[%s4382_s8] sm:$0xff]  }
 0x1cc   :  { %3438 = vtanh.f32 %v3723_v26 }
 0x1d9   :  { %v3439_v33 = vpop.eup %3438 }
 0x1da   :  { %283 = vrot.lane.b32.xlu1 %v3439_v33, %s3594_s19 }
 0x24c   :  { %v284_v34 = vpop.permute.xlu1 %283 }
 0x24d   :  { %v286_v35 = vmul.f32 %v284_v34, %v268_v21 }
 0x24f   :  { %v287_v36 = vpack.c.bf16 %v286_v35, %v286_v35 }
 0x251   :  { %289 = vrot.lane.b32.xlu1 %v287_v36, %s3595_s20 }
 0x2c3   :  { %v290_v47 = vpop.permute.xlu1 %289 }
 0x2c4   :  { %3084 = vmatmul.mubr.msk.bf16.vlgmr.msra.gmra.mxu1 %vm220_vm3, %v290_v47 }
 0x2c5   :  { %3096 = vmatpush3.bf16.msra.mxu1 %v3690_v3  ;;  %3099 = vmatprep.mubr.msk.bf16.mxu1 %vm3592_vm2, %v3591_v1 }
 0x2c6   :  { %3097 = vmatprep.subr.bf16.mxu1 %v3591_v1 }
 0x2c9   :  { %3098 = vmatpush3.bf16.msra.mxu1 %v3705_v6 }
 0x2ca   :  { %3111 = vmatprep.subr.bf16.mxu1 %v3591_v1 }
 0x2cc   :  { %3100 = vmatmul.mubr.msk.bf16.vlgmr.msra.gmra.mxu1 %vm220_vm3, %v290_v47 }
 0x2cd   :  { %3115 = vmatprep.mubr.msk.bf16.mxu1 %vm3592_vm2, %v3591_v1  ;;  %3112 = vmatpush3.bf16.msra.mxu1 %v3810_v23 }
 0x2ce   :  { %3113 = vmatprep.subr.bf16.mxu1 %v3591_v1 }
 0x2d1   :  { %3114 = vmatpush3.bf16.msra.mxu1 %v3815_v25 }
 0x2d2   :  { %3127 = vmatprep.subr.bf16.mxu1 %v3591_v1 }
 0x2d4   :  { %3116 = vmatmul.mubr.bf16.vlgmr.msra.gmra.mxu1 %v3593_v7 }
 0x2d5   :  { %3128 = vmatpush3.bf16.msra.mxu1 %v3735_v29  ;;  %3131 = vmatprep.mubr.msk.bf16.mxu1 %vm3592_vm2, %v3591_v1 }
 0x2d6   :  { %3129 = vmatprep.subr.bf16.mxu1 %v3591_v1 }
 0x2d9   :  { %3130 = vmatpush3.bf16.msra.mxu1 %v3747_v31 }
 0x2da   :  { %3143 = vmatprep.subr.bf16.mxu1 %v3591_v1 }
 0x384   :  { %v340_v49 = vpop.f32.mrf.mxu1 }
 0x385   :  { %v346_v50 = vadd.f32 %v3792_v48, %v340_v49 }
 0x386   :  { %v3085_v51 = vpop.f32.mrf.mxu1 }
 0x387   :  { %v399_v52 = vadd.f32 %v393_v43, %v346_v50  ;;  %v3877_v50 = vld [vmem:[%s4384_s9] ss:$0 sm:$0xff] }
 0x388   :  { %v343_v53 = vpop.f32.mrf.mxu1 }
 0x389   :  { %3440 = vtanh.f32 %v399_v52  ;;  %v400_v63 = vmul.f32 0.5, %v399_v52 }
 0x38a   :  { %v3086_v54 = vpop.f32.mrf.mxu1 }
 0x38c   :  { %v456_v56 = vpop.f32.mrf.mxu1 }
 0x38d   :  { %v462_v57 = vadd.f32 %v456_v56, %v147_v55 }
 0x38e   :  { %v3101_v58 = vpop.f32.mrf.mxu1 }
 0x38f   :  { %3442 = vtanh.f32 %v462_v57  ;;  %v463_v0 = vmul.f32 0.5, %v462_v57 }
 0x390   :  { %v459_v59 = vpop.f32.mrf.mxu1  ;;  %3444 = vtanh.f32 %v400_v63 }
 0x391   :  { %3446 = vtanh.f32 %v463_v0 }
 0x392   :  { %v3102_v60 = vpop.f32.mrf.mxu1 }
 0x394   :  { %v591_v43 = vpop.f32.mrf.mxu1 }
 0x396   :  { %v3441_v61 = vpop.eup %3440  ;;  %v3117_v44 = vpop.f32.mrf.mxu1 }
 0x397   :  { %407 = vrot.lane.b32.xlu0 %v3441_v61, %s3594_s19 }
 0x398   :  { %v594_v45 = vpop.f32.mrf.mxu1 }
 0x39a   :  { %v3118_v46 = vpop.f32.mrf.mxu1 }
 0x39c   :  { %v3443_v62 = vpop.eup %3442 }
 0x39d   :  { %470 = vrot.lane.b32.xlu1 %v3443_v62, %s3594_s19  ;;  %v3445_v2 = vpop.eup %3444 }
 0x39e   :  { %v402_v4 = vmul.f32 0.5, %v3445_v2  ;;  %v3447_v5 = vpop.eup %3446 }
 0x39f   :  { %v465_v13 = vmul.f32 0.5, %v3447_v5  ;;  %v152_v5 = vadd.f32 %v3713_v8, %v3718_v9 }
 0x3a0   :  { %v403_v10 = vadd.f32 0.5, %v402_v4 }
 0x3a1   :  { %v466_v14 = vadd.f32 0.5, %v465_v13 }
 0x3a2   :  { %v405_v17 = vmul.f32 0.0, %v403_v10 }
 0x3a3   :  { %v468_v20 = vmul.f32 %v466_v14, %v3723_v26  ;;  %v3822_v26 = vld [vmem:[%s4383_s7 + $0x8] sm:$0xff]  }
 0x3a4   :  { %3104 = vmatpush3.bf16.msra.mxu0 %v3822_v26 }
 0x3a5   :  { %3105 = vmatprep.subr.bf16.mxu0 %v3591_v1 }
 0x3a8   :  { %3106 = vmatpush3.bf16.msra.mxu0 %v3829_v27 }
 0x3a9   :  { %3119 = vmatprep.subr.bf16.mxu0 %v3591_v1 }
 0x409   :  { %v408_v11 = vpop.permute.xlu0 %407 }
 0x40a   :  { %v410_v12 = vmul.f32 %v408_v11, %v403_v10 }
 0x40c   :  { %412 = vrot.lane.b32.xlu0 %v410_v12, %s3595_s20 }
 0x40f   :  { %v471_v15 = vpop.permute.xlu1 %470 }
 0x410   :  { %v473_v16 = vmul.f32 %v471_v15, %v466_v14 }
 0x412   :  { %475 = vrot.lane.b32.xlu1 %v473_v16, %s3595_s20 }
 0x47e   :  { %v413_v18 = vpop.permute.xlu0 %412 }
 0x47f   :  { %v3800_v19 = vadd.f32 %v413_v18, %v405_v17 }
 0x481   :  { %3448 = vtanh.f32 %v3800_v19 }
 0x484   :  { %v476_v21 = vpop.permute.xlu1 %475 }
 0x485   :  { %v3804_v22 = vadd.f32 %v476_v21, %v468_v20 }
 0x487   :  { %3450 = vtanh.f32 %v3804_v22 }
 0x48e   :  { %v3449_v24 = vpop.eup %3448 }
 0x48f   :  { %418 = vrot.lane.b32.xlu0 %v3449_v24, %s3594_s19 }
 0x494   :  { %v3451_v28 = vpop.eup %3450 }
 0x495   :  { %481 = vrot.lane.b32.xlu1 %v3451_v28, %s3594_s19 }
 0x501   :  { %v419_v33 = vpop.permute.xlu0 %418 }
 0x502   :  { %v421_v34 = vmul.f32 %v419_v33, %v403_v10 }
 0x504   :  { %v485_v35 = vpack.c.bf16 %v421_v34, %v421_v34 }
 0x506   :  { %487 = vrot.lane.b32.xlu0 %v485_v35, %s3595_s20 }
 0x507   :  { %v482_v36 = vpop.permute.xlu1 %481 }
 0x508   :  { %v484_v7 = vmul.f32 %v482_v36, %v466_v14 }
 0x50a   :  { %v620_v38 = vpack.c.bf16 %v484_v7, %v484_v7 }
 0x50c   :  { %622 = vrot.lane.b32.xlu1 %v620_v38, %s3595_s20 }
 0x578   :  { %v488_v47 = vpop.permute.xlu0 %487 }
 0x579   :  { %3108 = vmatmul.mubr.msk.bf16.vlgmr.msra.gmra.mxu0 %vm220_vm3, %v488_v47  ;;  %3132 = vmatmul.mubr.msk.bf16.vlgmr.msra.gmra.mxu1 %vm220_vm3, %v488_v47 }
 0x57a   :  { %3120 = vmatpush3.bf16.msra.mxu0 %v3741_v30  ;;  %3123 = vmatprep.mubr.msk.bf16.mxu0 %vm3592_vm2, %v3591_v1 }
 0x57b   :  { %3121 = vmatprep.subr.bf16.mxu0 %v3591_v1  ;;  %3144 = vmatpush3.bf16.msra.mxu1 %v3822_v26 }
 0x57c   :  { %3145 = vmatprep.subr.bf16.mxu1 %v3591_v1  ;;  %3147 = vmatprep.mubr.msk.bf16.mxu1 %vm3592_vm2, %v3591_v1 }
 0x57e   :  { %3122 = vmatpush3.bf16.msra.mxu0 %v3754_v32  ;;  %v623_v49 = vpop.permute.xlu1 %622 }
 0x57f   :  { %3135 = vmatprep.subr.bf16.mxu0 %v3591_v1  ;;  %3146 = vmatpush3.bf16.msra.mxu1 %v3829_v27 }
 0x580   :  { %3159 = vmatprep.subr.bf16.mxu1 %v3591_v1 }
 0x581   :  { %3124 = vmatmul.mubr.msk.bf16.vlgmr.msra.gmra.mxu0 %vm220_vm3, %v623_v49 }
 0x582   :  { %3136 = vmatpush3.bf16.msra.mxu0 %v3690_v3  ;;  %3139 = vmatprep.mubr.msk.bf16.mxu0 %vm3592_vm2, %v3591_v1 }
 0x583   :  { %3137 = vmatprep.subr.bf16.mxu0 %v3591_v1 }
 0x586   :  { %3138 = vmatpush3.bf16.msra.mxu0 %v3705_v6 }
 0x587   :  { %3151 = vmatprep.subr.bf16.mxu0 %v3591_v1 }
 0x589   :  { %3140 = vmatmul.mubr.msk.bf16.vlgmr.msra.gmra.mxu0 %vm220_vm3, %v623_v49 }
 0x58a   :  { %3152 = vmatpush3.bf16.msra.mxu0 %v3810_v23  ;;  %3155 = vmatprep.mubr.msk.bf16.mxu0 %vm3592_vm2, %v3591_v1 }
 0x58b   :  { %3153 = vmatprep.subr.bf16.mxu0 %v3591_v1 }
 0x58e   :  { %3154 = vmatpush3.bf16.msra.mxu0 %v3815_v25 }
 0x58f   :  { %3167 = vmatprep.subr.bf16.mxu0 %v3591_v1 }
 0x639   :  { %v538_v51 = vpop.f32.mrf.mxu0  ;;  %v702_v52 = vpop.f32.mrf.mxu1 }
 0x63a   :  { %v544_v53 = vadd.f32 %v3877_v50, %v538_v51 }
 0x63b   :  { %v3109_v54 = vpop.f32.mrf.mxu0  ;;  %v3133_v55 = vpop.f32.mrf.mxu1 }
 0x63c   :  { %v597_v56 = vadd.f32 %v591_v43, %v544_v53 }
 0x63d   :  { %v541_v57 = vpop.f32.mrf.mxu0  ;;  %v705_v58 = vpop.f32.mrf.mxu1 }
 0x63e   :  { %3452 = vtanh.f32 %v597_v56  ;;  %v598_v18 = vmul.f32 0.5, %v597_v56 }
 0x63f   :  { %v3110_v59 = vpop.f32.mrf.mxu0  ;;  %v3134_v60 = vpop.f32.mrf.mxu1 }
 0x641   :  { %v661_v61 = vpop.f32.mrf.mxu0 }
 0x642   :  { %v667_v62 = vadd.f32 %v3792_v48, %v661_v61 }
 0x643   :  { %v3125_v63 = vpop.f32.mrf.mxu0 }
 0x644   :  { %v708_v0 = vadd.f32 %v702_v52, %v667_v62 }
 0x645   :  { %v664_v2 = vpop.f32.mrf.mxu0 }
 0x646   :  { %3454 = vtanh.f32 %v708_v0  ;;  %v709_v20 = vmul.f32 0.5, %v708_v0 }
 0x647   :  { %v3126_v4 = vpop.f32.mrf.mxu0 }
 0x649   :  { %v765_v10 = vpop.f32.mrf.mxu0 }
 0x64a   :  { %v771_v11 = vadd.f32 %v765_v10, %v152_v5 }
 0x64b   :  { %v3453_v12 = vpop.eup %3452  ;;  %v3141_v13 = vpop.f32.mrf.mxu0 }
 0x64c   :  { %3456 = vtanh.f32 %v771_v11  ;;  %605 = vrot.lane.b32.xlu1 %v3453_v12, %s3594_s19  ;;  %v772_v8 = vmul.f32 0.5, %v771_v11 }
 0x64d   :  { %v768_v14 = vpop.f32.mrf.mxu0  ;;  %3458 = vtanh.f32 %v598_v18 }
 0x64e   :  { %3460 = vtanh.f32 %v709_v20 }
 0x64f   :  { %v3142_v15 = vpop.f32.mrf.mxu0  ;;  %3462 = vtanh.f32 %v772_v8 }
 0x653   :  { %v3455_v16 = vpop.eup %3454 }
 0x654   :  { %716 = vrot.lane.b32.xlu0 %v3455_v16, %s3594_s19 }
 0x659   :  { %v3457_v17 = vpop.eup %3456 }
 0x65a   :  { %779 = vrot.lane.b32.xlu0 %v3457_v17, %s3594_s19  ;;  %v3459_v21 = vpop.eup %3458 }
 0x65b   :  { %v600_v24 = vmul.f32 0.5, %v3459_v21  ;;  %v3461_v33 = vpop.eup %3460 }
 0x65c   :  { %v711_v36 = vmul.f32 0.5, %v3461_v33  ;;  %v3463_v7 = vpop.eup %3462 }
 0x65d   :  { %v601_v28 = vadd.f32 0.5, %v600_v24  ;;  %v774_v45 = vmul.f32 0.5, %v3463_v7 }
 0x65e   :  { %v712_v38 = vadd.f32 0.5, %v711_v36 }
 0x65f   :  { %v775_v46 = vadd.f32 0.5, %v774_v45  ;;  %v603_v51 = vmul.f32 0.0, %v601_v28 }
 0x660   :  { %v714_v54 = vmul.f32 %v712_v38, %v3800_v19 }
 0x661   :  { %v777_v57 = vmul.f32 %v775_v46, %v3804_v22 }
 0x6be   :  { %v606_v34 = vpop.permute.xlu1 %605 }
 0x6bf   :  { %v608_v35 = vmul.f32 %v606_v34, %v601_v28 }
 0x6c1   :  { %610 = vrot.lane.b32.xlu0 %v608_v35, %s3595_s20 }
 0x6c6   :  { %v717_v43 = vpop.permute.xlu0 %716 }
 0x6c7   :  { %v719_v44 = vmul.f32 %v717_v43, %v712_v38 }
 0x6c9   :  { %721 = vrot.lane.b32.xlu1 %v719_v44, %s3595_s20 }
 0x6cc   :  { %v780_v47 = vpop.permute.xlu0 %779 }
 0x6cd   :  { %v782_v49 = vmul.f32 %v780_v47, %v775_v46 }
 0x6cf   :  { %784 = vrot.lane.b32.xlu1 %v782_v49, %s3595_s20  ;;  %v155_v49 = vadd.f32 %v3769_v37, %v3718_v9 }
 0x733   :  { %v611_v52 = vpop.permute.xlu0 %610 }
 0x734   :  { %v3889_v53 = vadd.f32 %v611_v52, %v603_v51 }
 0x736   :  { %3464 = vtanh.f32 %v3889_v53 }
 0x73b   :  { %v722_v55 = vpop.permute.xlu1 %721 }
 0x73c   :  { %v3893_v56 = vadd.f32 %v722_v55, %v714_v54 }
 0x73e   :  { %3466 = vtanh.f32 %v3893_v56 }
 0x741   :  { %v785_v58 = vpop.permute.xlu1 %784 }
 0x742   :  { %v3897_v59 = vadd.f32 %v785_v58, %v777_v57 }
 0x743   :  { %v3465_v60 = vpop.eup %3464 }
 0x744   :  { %3468 = vtanh.f32 %v3897_v59  ;;  %616 = vrot.lane.b32.xlu1 %v3465_v60, %s3594_s19 }
 0x74b   :  { %v3467_v61 = vpop.eup %3466 }
 0x74c   :  { %727 = vrot.lane.b32.xlu0 %v3467_v61, %s3594_s19 }
 0x751   :  { %v3469_v62 = vpop.eup %3468 }
 0x752   :  { %790 = vrot.lane.b32.xlu0 %v3469_v62, %s3594_s19 }
 0x7b6   :  { %v617_v19 = vpop.permute.xlu1 %616 }
 0x7b7   :  { %v619_v63 = vmul.f32 %v617_v19, %v601_v28 }
 0x7b9   :  { %v842_v0 = vpack.c.bf16 %v619_v63, %v619_v63 }
 0x7bb   :  { %844 = vrot.lane.b32.xlu0 %v842_v0, %s3595_s20 }
 0x7be   :  { %v728_v22 = vpop.permute.xlu0 %727 }
 0x7bf   :  { %v730_v2 = vmul.f32 %v728_v22, %v712_v38 }
 0x7c1   :  { %v794_v4 = vpack.c.bf16 %v730_v2, %v730_v2 }
 0x7c3   :  { %796 = vrot.lane.b32.xlu1 %v794_v4, %s3595_s20 }
 0x7c4   :  { %v791_v5 = vpop.permute.xlu0 %790 }
 0x7c5   :  { %v793_v10 = vmul.f32 %v791_v5, %v775_v46 }
 0x7c7   :  { %v912_v11 = vpack.c.bf16 %v793_v10, %v793_v10 }
 0x7c9   :  { %914 = vrot.lane.b32.xlu1 %v912_v11, %s3595_s20 }
 0x82d   :  { %v845_v12 = vpop.permute.xlu0 %844 }
 0x82e   :  { %3156 = vmatmul.mubr.msk.bf16.vlgmr.msra.gmra.mxu0 %vm220_vm3, %v845_v12 }
 0x82f   :  { %3168 = vmatpush3.bf16.msra.mxu0 %v3735_v29  ;;  %3171 = vmatprep.mubr.msk.bf16.mxu0 %vm3592_vm2, %v3591_v1 }
 0x830   :  { %3169 = vmatprep.subr.bf16.mxu0 %v3591_v1 }
 0x833   :  { %3170 = vmatpush3.bf16.msra.mxu0 %v3747_v31 }
 0x834   :  { %3183 = vmatprep.subr.bf16.mxu0 %v3591_v1 }
 0x835   :  { %v797_v13 = vpop.permute.xlu1 %796 }
 0x836   :  { %3148 = vmatmul.mubr.msk.bf16.vlgmr.msra.gmra.mxu1 %vm220_vm3, %v797_v13  ;;  %3172 = vmatmul.mubr.msk.bf16.vlgmr.msra.gmra.mxu0 %vm220_vm3, %v797_v13 }
 0x837   :  { %3160 = vmatpush3.bf16.msra.mxu1 %v3741_v30  ;;  %3163 = vmatprep.mubr.msk.bf16.mxu1 %vm3592_vm2, %v3591_v1 }
 0x838   :  { %3161 = vmatprep.subr.bf16.mxu1 %v3591_v1  ;;  %3184 = vmatpush3.bf16.msra.mxu0 %v3822_v26 }
 0x839   :  { %3185 = vmatprep.subr.bf16.mxu0 %v3591_v1  ;;  %3187 = vmatprep.mubr.msk.bf16.mxu0 %vm3592_vm2, %v3591_v1 }
 0x83b   :  { %3162 = vmatpush3.bf16.msra.mxu1 %v3754_v32  ;;  %v915_v14 = vpop.permute.xlu1 %914 }
 0x83c   :  { %3175 = vmatprep.subr.bf16.mxu1 %v3591_v1  ;;  %3186 = vmatpush3.bf16.msra.mxu0 %v3829_v27 }
 0x83d   :  { %3199 = vmatprep.subr.bf16.mxu0 %v3591_v1 }
 0x83e   :  { %3164 = vmatmul.mubr.msk.bf16.vlgmr.msra.gmra.mxu1 %vm220_vm3, %v915_v14 }
 0x83f   :  { %3176 = vmatpush3.bf16.msra.mxu1 %v3690_v3  ;;  %3179 = vmatprep.mubr.msk.bf16.mxu1 %vm3592_vm2, %v3591_v1 }
 0x840   :  { %3177 = vmatprep.subr.bf16.mxu1 %v3591_v1 }
 0x843   :  { %3178 = vmatpush3.bf16.msra.mxu1 %v3705_v6 }
 0x844   :  { %3191 = vmatprep.subr.bf16.mxu1 %v3591_v1 }
 0x846   :  { %3180 = vmatmul.mubr.msk.bf16.vlgmr.msra.gmra.mxu1 %vm220_vm3, %v915_v14 }
 0x847   :  { %3192 = vmatpush3.bf16.msra.mxu1 %v3810_v23  ;;  %3195 = vmatprep.mubr.msk.bf16.mxu1 %vm3592_vm2, %v3591_v1 }
 0x848   :  { %3193 = vmatprep.subr.bf16.mxu1 %v3591_v1 }
 0x84b   :  { %3194 = vmatpush3.bf16.msra.mxu1 %v3815_v25 }
 0x84c   :  { %3207 = vmatprep.subr.bf16.mxu1 %v3591_v1 }
 0x8ee   :  { %v883_v15 = vpop.f32.mrf.mxu0 }
 0x8f0   :  { %v3157_v16 = vpop.f32.mrf.mxu0 }
 0x8f2   :  { %v886_v17 = vpop.f32.mrf.mxu0 }
 0x8f4   :  { %v3158_v18 = vpop.f32.mrf.mxu0 }
 0x8f6   :  { %v835_v20 = vpop.f32.mrf.mxu1  ;;  %v994_v8 = vpop.f32.mrf.mxu0 }
 0x8f7   :  { %v841_v21 = vadd.f32 %v3877_v50, %v835_v20 }
 0x8f8   :  { %v3149_v24 = vpop.f32.mrf.mxu1  ;;  %v3173_v28 = vpop.f32.mrf.mxu0 }
 0x8f9   :  { %v889_v33 = vadd.f32 %v883_v15, %v841_v21 }
 0x8fa   :  { %v838_v34 = vpop.f32.mrf.mxu1  ;;  %v997_v35 = vpop.f32.mrf.mxu0 }
 0x8fb   :  { %3470 = vtanh.f32 %v889_v33  ;;  %v890_v62 = vmul.f32 0.5, %v889_v33 }
 0x8fc   :  { %v3150_v36 = vpop.f32.mrf.mxu1  ;;  %v3174_v7 = vpop.f32.mrf.mxu0 }
 0x8fe   :  { %v953_v38 = vpop.f32.mrf.mxu1 }
 0x8ff   :  { %v959_v43 = vadd.f32 %v3792_v48, %v953_v38 }
 0x900   :  { %v3165_v44 = vpop.f32.mrf.mxu1 }
 0x901   :  { %v1000_v45 = vadd.f32 %v994_v8, %v959_v43 }
 0x902   :  { %v956_v46 = vpop.f32.mrf.mxu1 }
 0x903   :  { %3472 = vtanh.f32 %v1000_v45  ;;  %v1001_v19 = vmul.f32 0.5, %v1000_v45 }
 0x904   :  { %v3166_v47 = vpop.f32.mrf.mxu1 }
 0x906   :  { %v1057_v51 = vpop.f32.mrf.mxu1 }
 0x907   :  { %v1063_v52 = vadd.f32 %v1057_v51, %v155_v49 }
 0x908   :  { %v3471_v54 = vpop.eup %3470  ;;  %v3181_v55 = vpop.f32.mrf.mxu1 }
 0x909   :  { %3474 = vtanh.f32 %v1063_v52  ;;  %897 = vrot.lane.b32.xlu1 %v3471_v54, %s3594_s19  ;;  %v1064_v37 = vmul.f32 0.5, %v1063_v52 }
 0x90a   :  { %v1060_v57 = vpop.f32.mrf.mxu1  ;;  %3476 = vtanh.f32 %v890_v62 }
 0x90b   :  { %3478 = vtanh.f32 %v1001_v19 }
 0x90c   :  { %v3182_v58 = vpop.f32.mrf.mxu1  ;;  %3480 = vtanh.f32 %v1064_v37 }
 0x910   :  { %v3473_v60 = vpop.eup %3472 }
 0x911   :  { %1008 = vrot.lane.b32.xlu0 %v3473_v60, %s3594_s19 }
 0x916   :  { %v3475_v61 = vpop.eup %3474 }
 0x917   :  { %1071 = vrot.lane.b32.xlu0 %v3475_v61, %s3594_s19  ;;  %v3477_v63 = vpop.eup %3476 }
 0x918   :  { %v892_v0 = vmul.f32 0.5, %v3477_v63  ;;  %v3479_v2 = vpop.eup %3478 }
 0x919   :  { %v1003_v10 = vmul.f32 0.5, %v3479_v2  ;;  %v3481_v11 = vpop.eup %3480 }
 0x91a   :  { %v893_v22 = vadd.f32 0.5, %v892_v0  ;;  %v1066_v15 = vmul.f32 0.5, %v3481_v11 }
 0x91b   :  { %v1004_v12 = vadd.f32 0.5, %v1003_v10 }
 0x91c   :  { %v1067_v16 = vadd.f32 0.5, %v1066_v15  ;;  %v895_v20 = vmul.f32 %v893_v22, %v3889_v53  ;;  %v160_v15 = vadd.f32 %v3718_v9, %v3773_v40 }
 0x91d   :  { %v1006_v24 = vmul.f32 %v1004_v12, %v3893_v56 }
 0x91e   :  { %v1069_v34 = vmul.f32 %v1067_v16, %v3897_v59 }
 0x97b   :  { %v898_v4 = vpop.permute.xlu1 %897 }
 0x97c   :  { %v900_v5 = vmul.f32 %v898_v4, %v893_v22 }
 0x97e   :  { %902 = vrot.lane.b32.xlu0 %v900_v5, %s3595_s20 }
 0x983   :  { %v1009_v13 = vpop.permute.xlu0 %1008 }
 0x984   :  { %v1011_v14 = vmul.f32 %v1009_v13, %v1004_v12 }
 0x986   :  { %1013 = vrot.lane.b32.xlu1 %v1011_v14, %s3595_s20 }
 0x989   :  { %v1072_v17 = vpop.permute.xlu0 %1071 }
 0x98a   :  { %v1074_v18 = vmul.f32 %v1072_v17, %v1067_v16 }
 0x98c   :  { %1076 = vrot.lane.b32.xlu1 %v1074_v18, %s3595_s20 }
 0x9f0   :  { %v903_v8 = vpop.permute.xlu0 %902 }
 0x9f1   :  { %v3952_v21 = vadd.f32 %v903_v8, %v895_v20 }
 0x9f3   :  { %3482 = vtanh.f32 %v3952_v21 }
 0x9f8   :  { %v1014_v28 = vpop.permute.xlu1 %1013 }
 0x9f9   :  { %v3956_v33 = vadd.f32 %v1014_v28, %v1006_v24 }
 0x9fb   :  { %3484 = vtanh.f32 %v3956_v33 }
 0x9fe   :  { %v1077_v35 = vpop.permute.xlu1 %1076 }
 0x9ff   :  { %v3960_v36 = vadd.f32 %v1077_v35, %v1069_v34 }
 0xa00   :  { %v3483_v7 = vpop.eup %3482 }
 0xa01   :  { %3486 = vtanh.f32 %v3960_v36  ;;  %908 = vrot.lane.b32.xlu1 %v3483_v7, %s3594_s19 }
 0xa08   :  { %v3485_v53 = vpop.eup %3484 }
 0xa09   :  { %1019 = vrot.lane.b32.xlu0 %v3485_v53, %s3594_s19 }
 0xa0e   :  { %v3487_v38 = vpop.eup %3486 }
 0xa0f   :  { %1082 = vrot.lane.b32.xlu0 %v3487_v38, %s3594_s19 }
 0xa73   :  { %v909_v56 = vpop.permute.xlu1 %908 }
 0xa74   :  { %v911_v43 = vmul.f32 %v909_v56, %v893_v22 }
 0xa76   :  { %v1134_v44 = vpack.c.bf16 %v911_v43, %v911_v43 }
 0xa78   :  { %1136 = vrot.lane.b32.xlu0 %v1134_v44, %s3595_s20 }
 0xa7b   :  { %v1020_v59 = vpop.permute.xlu0 %1019 }
 0xa7c   :  { %v1022_v45 = vmul.f32 %v1020_v59, %v1004_v12 }
 0xa7e   :  { %v1086_v46 = vpack.c.bf16 %v1022_v45, %v1022_v45 }
 0xa80   :  { %1088 = vrot.lane.b32.xlu1 %v1086_v46, %s3595_s20 }
 0xa81   :  { %v1083_v47 = vpop.permute.xlu0 %1082 }
 0xa82   :  { %v1085_v49 = vmul.f32 %v1083_v47, %v1067_v16 }
 0xa84   :  { %v1204_v51 = vpack.c.bf16 %v1085_v49, %v1085_v49 }
 0xa86   :  { %1206 = vrot.lane.b32.xlu1 %v1204_v51, %s3595_s20 }
 0xaea   :  { %v1137_v52 = vpop.permute.xlu0 %1136 }
 0xaeb   :  { %3196 = vmatmul.mubr.msk.bf16.vlgmr.msra.gmra.mxu1 %vm220_vm3, %v1137_v52 }
 0xaec   :  { %3208 = vmatpush3.bf16.msra.mxu1 %v3735_v29  ;;  %3211 = vmatprep.mubr.msk.bf16.mxu1 %vm3592_vm2, %v3591_v1 }
 0xaed   :  { %3209 = vmatprep.subr.bf16.mxu1 %v3591_v1 }
 0xaf0   :  { %3210 = vmatpush3.bf16.msra.mxu1 %v3747_v31 }
 0xaf1   :  { %3223 = vmatprep.subr.bf16.mxu1 %v3591_v1 }
 0xaf2   :  { %v1089_v54 = vpop.permute.xlu1 %1088 }
 0xaf3   :  { %3188 = vmatmul.mubr.msk.bf16.vlgmr.msra.gmra.mxu0 %vm220_vm3, %v1089_v54  ;;  %3212 = vmatmul.mubr.msk.bf16.vlgmr.msra.gmra.mxu1 %vm220_vm3, %v1089_v54 }
 0xaf4   :  { %3200 = vmatpush3.bf16.msra.mxu0 %v3741_v30  ;;  %3203 = vmatprep.mubr.msk.bf16.mxu0 %vm3592_vm2, %v3591_v1 }
 0xaf5   :  { %3201 = vmatprep.subr.bf16.mxu0 %v3591_v1  ;;  %3224 = vmatpush3.bf16.msra.mxu1 %v3822_v26 }
 0xaf6   :  { %3225 = vmatprep.subr.bf16.mxu1 %v3591_v1  ;;  %3227 = vmatprep.mubr.msk.bf16.mxu1 %vm3592_vm2, %v3591_v1 }
 0xaf8   :  { %3202 = vmatpush3.bf16.msra.mxu0 %v3754_v32  ;;  %v1207_v55 = vpop.permute.xlu1 %1206 }
 0xaf9   :  { %3215 = vmatprep.subr.bf16.mxu0 %v3591_v1  ;;  %3226 = vmatpush3.bf16.msra.mxu1 %v3829_v27 }
 0xafa   :  { %3239 = vmatprep.subr.bf16.mxu1 %v3591_v1 }
 0xafb   :  { %3204 = vmatmul.mubr.msk.bf16.vlgmr.msra.gmra.mxu0 %vm220_vm3, %v1207_v55 }
 0xafc   :  { %3216 = vmatpush3.bf16.msra.mxu0 %v3690_v3  ;;  %3219 = vmatprep.mubr.msk.bf16.mxu0 %vm3592_vm2, %v3591_v1 }
 0xafd   :  { %3217 = vmatprep.subr.bf16.mxu0 %v3591_v1 }
 0xb00   :  { %3218 = vmatpush3.bf16.msra.mxu0 %v3705_v6 }
 0xb01   :  { %3231 = vmatprep.subr.bf16.mxu0 %v3591_v1 }
 0xb03   :  { %3220 = vmatmul.mubr.msk.bf16.vlgmr.msra.gmra.mxu0 %vm220_vm3, %v1207_v55 }
 0xb04   :  { %3232 = vmatpush3.bf16.msra.mxu0 %v3810_v23  ;;  %3235 = vmatprep.mubr.msk.bf16.mxu0 %vm3592_vm2, %v3591_v1 }
 0xb05   :  { %3233 = vmatprep.subr.bf16.mxu0 %v3591_v1 }
 0xb08   :  { %3234 = vmatpush3.bf16.msra.mxu0 %v3815_v25 }
 0xb09   :  { %3247 = vmatprep.subr.bf16.mxu0 %v3591_v1 }
 0xbab   :  { %v1175_v3 = vpop.f32.mrf.mxu1 }
 0xbad   :  { %v3197_v57 = vpop.f32.mrf.mxu1 }
 0xbaf   :  { %v1178_v58 = vpop.f32.mrf.mxu1 }
 0xbb1   :  { %v3198_v60 = vpop.f32.mrf.mxu1 }
 0xbb3   :  { %v1127_v6 = vpop.f32.mrf.mxu0  ;;  %v1286_v61 = vpop.f32.mrf.mxu1 }
 0xbb4   :  { %v1133_v62 = vadd.f32 %v3877_v50, %v1127_v6 }
 0xbb5   :  { %v3189_v19 = vpop.f32.mrf.mxu0  ;;  %v3213_v37 = vpop.f32.mrf.mxu1 }
 0xbb6   :  { %v1181_v63 = vadd.f32 %v1175_v3, %v1133_v62 }
 0xbb7   :  { %v1130_v0 = vpop.f32.mrf.mxu0  ;;  %v1289_v22 = vpop.f32.mrf.mxu1 }
 0xbb8   :  { %3488 = vtanh.f32 %v1181_v63  ;;  %v1182_v35 = vmul.f32 0.5, %v1181_v63 }
 0xbb9   :  { %v3190_v2 = vpop.f32.mrf.mxu0  ;;  %v3214_v4 = vpop.f32.mrf.mxu1 }
 0xbbb   :  { %v1245_v5 = vpop.f32.mrf.mxu0 }
 0xbbc   :  { %v1251_v10 = vadd.f32 %v3792_v48, %v1245_v5 }
 0xbbd   :  { %v3205_v11 = vpop.f32.mrf.mxu0 }
 0xbbe   :  { %v1292_v12 = vadd.f32 %v1286_v61, %v1251_v10 }
 0xbbf   :  { %v1248_v13 = vpop.f32.mrf.mxu0 }
 0xbc0   :  { %3490 = vtanh.f32 %v1292_v12  ;;  %v1293_v7 = vmul.f32 0.5, %v1292_v12 }
 0xbc1   :  { %v3206_v14 = vpop.f32.mrf.mxu0 }
 0xbc3   :  { %v1349_v16 = vpop.f32.mrf.mxu0 }
 0xbc4   :  { %v1355_v17 = vadd.f32 %v1349_v16, %v160_v15 }
 0xbc5   :  { %v3489_v18 = vpop.eup %3488  ;;  %v3221_v20 = vpop.f32.mrf.mxu0 }
 0xbc6   :  { %3492 = vtanh.f32 %v1355_v17  ;;  %1189 = vrot.lane.b32.xlu1 %v3489_v18, %s3594_s19  ;;  %v1356_v9 = vmul.f32 0.5, %v1355_v17 }
 0xbc7   :  { %v1352_v8 = vpop.f32.mrf.mxu0  ;;  %3494 = vtanh.f32 %v1182_v35 }
 0xbc8   :  { %3496 = vtanh.f32 %v1293_v7 }
 0xbc9   :  { %v3222_v24 = vpop.f32.mrf.mxu0  ;;  %3498 = vtanh.f32 %v1356_v9 }
 0xbcd   :  { %v3491_v28 = vpop.eup %3490 }
 0xbce   :  { %1300 = vrot.lane.b32.xlu0 %v3491_v28, %s3594_s19 }
 0xbd3   :  { %v3493_v34 = vpop.eup %3492 }
 0xbd4   :  { %1363 = vrot.lane.b32.xlu0 %v3493_v34, %s3594_s19  ;;  %v3495_v40 = vpop.eup %3494 }
 0xbd5   :  { %v1184_v53 = vmul.f32 0.5, %v3495_v40  ;;  %v3497_v56 = vpop.eup %3496 }
 0xbd6   :  { %v1295_v59 = vmul.f32 0.5, %v3497_v56  ;;  %v3499_v45 = vpop.eup %3498  ;;  %v4082_v56 = vld [vmem:[%s4378_s3] ss:$0 sm:$0xff] }
 0xbd7   :  { %v1185_v38 = vadd.f32 0.5, %v1184_v53  ;;  %v1358_v51 = vmul.f32 0.5, %v3499_v45 }
 0xbd8   :  { %v1296_v46 = vadd.f32 0.5, %v1295_v59 }
 0xbd9   :  { %v1359_v52 = vadd.f32 0.5, %v1358_v51  ;;  %v1187_v3 = vmul.f32 %v1185_v38, %v3952_v21 }
 0xbda   :  { %v1298_v60 = vmul.f32 %v1296_v46, %v3956_v33 }
 0xbdb   :  { %v1361_v62 = vmul.f32 %v1359_v52, %v3960_v36 }
 0xc38   :  { %v1190_v43 = vpop.permute.xlu1 %1189 }
 0xc39   :  { %v1192_v44 = vmul.f32 %v1190_v43, %v1185_v38  ;;  %v163_v43 = vadd.f32 %v4082_v56, %v3777_v42 }
 0xc3b   :  { %1194 = vrot.lane.b32.xlu0 %v1192_v44, %s3595_s20 }
 0xc40   :  { %v1301_v47 = vpop.permute.xlu0 %1300 }
 0xc41   :  { %v1303_v49 = vmul.f32 %v1301_v47, %v1296_v46 }
 0xc43   :  { %1305 = vrot.lane.b32.xlu1 %v1303_v49, %s3595_s20 }
 0xc46   :  { %v1364_v54 = vpop.permute.xlu0 %1363 }
 0xc47   :  { %v1366_v55 = vmul.f32 %v1364_v54, %v1359_v52 }
 0xc49   :  { %1368 = vrot.lane.b32.xlu1 %v1366_v55, %s3595_s20 }
 0xcad   :  { %v1195_v57 = vpop.permute.xlu0 %1194 }
 0xcae   :  { %v4015_v58 = vadd.f32 %v1195_v57, %v1187_v3 }
 0xcb0   :  { %3500 = vtanh.f32 %v4015_v58 }
 0xcb5   :  { %v1306_v6 = vpop.permute.xlu1 %1305 }
 0xcb6   :  { %v4019_v61 = vadd.f32 %v1306_v6, %v1298_v60 }
 0xcb8   :  { %3502 = vtanh.f32 %v4019_v61 }
 0xcbb   :  { %v1369_v19 = vpop.permute.xlu1 %1368 }
 0xcbc   :  { %v4023_v37 = vadd.f32 %v1369_v19, %v1361_v62 }
 0xcbd   :  { %v3501_v63 = vpop.eup %3500 }
 0xcbe   :  { %3504 = vtanh.f32 %v4023_v37  ;;  %1200 = vrot.lane.b32.xlu1 %v3501_v63, %s3594_s19 }
 0xcc5   :  { %v3503_v21 = vpop.eup %3502 }
 0xcc6   :  { %1311 = vrot.lane.b32.xlu0 %v3503_v21, %s3594_s19 }
 0xccb   :  { %v3505_v0 = vpop.eup %3504 }
 0xccc   :  { %1374 = vrot.lane.b32.xlu0 %v3505_v0, %s3594_s19 }
 0xd30   :  { %v1201_v33 = vpop.permute.xlu1 %1200 }
 0xd31   :  { %v1203_v22 = vmul.f32 %v1201_v33, %v1185_v38 }
 0xd33   :  { %v1426_v2 = vpack.c.bf16 %v1203_v22, %v1203_v22 }
 0xd35   :  { %1428 = vrot.lane.b32.xlu0 %v1426_v2, %s3595_s20 }
 0xd38   :  { %v1312_v36 = vpop.permute.xlu0 %1311 }
 0xd39   :  { %v1314_v4 = vmul.f32 %v1312_v36, %v1296_v46 }
 0xd3b   :  { %v1378_v5 = vpack.c.bf16 %v1314_v4, %v1314_v4 }
 0xd3d   :  { %1380 = vrot.lane.b32.xlu1 %v1378_v5, %s3595_s20 }
 0xd3e   :  { %v1375_v10 = vpop.permute.xlu0 %1374 }
 0xd3f   :  { %v1377_v11 = vmul.f32 %v1375_v10, %v1359_v52 }
 0xd41   :  { %v1496_v12 = vpack.c.bf16 %v1377_v11, %v1377_v11 }
 0xd43   :  { %1498 = vrot.lane.b32.xlu1 %v1496_v12, %s3595_s20 }
 0xda7   :  { %v1429_v13 = vpop.permute.xlu0 %1428 }
 0xda8   :  { %3236 = vmatmul.mubr.msk.bf16.vlgmr.msra.gmra.mxu0 %vm220_vm3, %v1429_v13 }
 0xda9   :  { %3248 = vmatpush3.bf16.msra.mxu0 %v3735_v29  ;;  %3251 = vmatprep.mubr.msk.bf16.mxu0 %vm3592_vm2, %v3591_v1 }
 0xdaa   :  { %3249 = vmatprep.subr.bf16.mxu0 %v3591_v1 }
 0xdad   :  { %3250 = vmatpush3.bf16.msra.mxu0 %v3747_v31  ;;  %v4066_v31 = vld [vmem:[%s4376_s2] sm:$0xff]  }
 0xdae   :  { %3263 = vmatprep.subr.bf16.mxu0 %v3591_v1 }
 0xdaf   :  { %v1381_v14 = vpop.permute.xlu1 %1380 }
 0xdb0   :  { %3228 = vmatmul.mubr.msk.bf16.vlgmr.msra.gmra.mxu1 %vm220_vm3, %v1381_v14  ;;  %3252 = vmatmul.mubr.msk.bf16.vlgmr.msra.gmra.mxu0 %vm220_vm3, %v1381_v14 }
 0xdb1   :  { %3240 = vmatpush3.bf16.msra.mxu1 %v3741_v30  ;;  %3243 = vmatprep.mubr.msk.bf16.mxu1 %vm3592_vm2, %v3591_v1  ;;  %v4057_v30 = vld [vmem:[%s4376_s2 + $0x8] sm:$0xff]  }
 0xdb2   :  { %3241 = vmatprep.subr.bf16.mxu1 %v3591_v1  ;;  %3264 = vmatpush3.bf16.msra.mxu0 %v3822_v26 }
 0xdb3   :  { %3265 = vmatprep.subr.bf16.mxu0 %v3591_v1  ;;  %3267 = vmatprep.mubr.msk.bf16.mxu0 %vm3592_vm2, %v3591_v1 }
 0xdb5   :  { %3242 = vmatpush3.bf16.msra.mxu1 %v3754_v32  ;;  %v1499_v29 = vpop.permute.xlu1 %1498 }
 0xdb6   :  { %3255 = vmatprep.subr.bf16.mxu1 %v3591_v1  ;;  %3266 = vmatpush3.bf16.msra.mxu0 %v3829_v27 }
 0xdb7   :  { %3279 = vmatprep.subr.bf16.mxu0 %v3591_v1 }
 0xdb8   :  { %3244 = vmatmul.mubr.msk.bf16.vlgmr.msra.gmra.mxu1 %vm220_vm3, %v1499_v29 }
 0xdb9   :  { %3256 = vmatpush3.bf16.msra.mxu1 %v4057_v30  ;;  %3259 = vmatprep.mubr.msk.bf16.mxu1 %vm3592_vm2, %v3591_v1 }
 0xdba   :  { %3257 = vmatprep.subr.bf16.mxu1 %v3591_v1 }
 0xdbd   :  { %3258 = vmatpush3.bf16.msra.mxu1 %v4066_v31 }
 0xdbe   :  { %3271 = vmatprep.subr.bf16.mxu1 %v3591_v1 }
 0xdc0   :  { %3260 = vmatmul.mubr.msk.bf16.vlgmr.msra.gmra.mxu1 %vm220_vm3, %v1499_v29 }
 0xdc1   :  { %3272 = vmatpush3.bf16.msra.mxu1 %v3810_v23  ;;  %3275 = vmatprep.mubr.msk.bf16.mxu1 %vm3592_vm2, %v3591_v1 }
 0xdc2   :  { %3273 = vmatprep.subr.bf16.mxu1 %v3591_v1 }
 0xdc5   :  { %3274 = vmatpush3.bf16.msra.mxu1 %v3815_v25 }
 0xdc6   :  { %3287 = vmatprep.subr.bf16.mxu1 %v3591_v1 }
 0xe68   :  { %v1467_v32 = vpop.f32.mrf.mxu0 }
 0xe6a   :  { %v3237_v26 = vpop.f32.mrf.mxu0 }
 0xe6c   :  { %v1470_v27 = vpop.f32.mrf.mxu0 }
 0xe6e   :  { %v3238_v15 = vpop.f32.mrf.mxu0 }
 0xe70   :  { %v1419_v16 = vpop.f32.mrf.mxu1  ;;  %v1578_v17 = vpop.f32.mrf.mxu0 }
 0xe71   :  { %v1425_v18 = vadd.f32 %v3877_v50, %v1419_v16 }
 0xe72   :  { %v3229_v20 = vpop.f32.mrf.mxu1  ;;  %v3253_v8 = vpop.f32.mrf.mxu0 }
 0xe73   :  { %v1473_v23 = vadd.f32 %v1467_v32, %v1425_v18 }
 0xe74   :  { %v1422_v24 = vpop.f32.mrf.mxu1  ;;  %v1581_v28 = vpop.f32.mrf.mxu0 }
 0xe75   :  { %3506 = vtanh.f32 %v1473_v23  ;;  %v1474_v52 = vmul.f32 0.5, %v1473_v23 }
 0xe76   :  { %v3230_v34 = vpop.f32.mrf.mxu1  ;;  %v3254_v35 = vpop.f32.mrf.mxu0 }
 0xe77   :  { %v4114_v34 = vld [vmem:[%s4379_s5 + $0x8] sm:$0xff]   ;;  %v4123_v35 = vld [vmem:[%s4379_s5] sm:$0xff]  }
 0xe78   :  { %v1537_v7 = vpop.f32.mrf.mxu1 }
 0xe79   :  { %v1543_v25 = vadd.f32 %v3792_v48, %v1537_v7 }
 0xe7a   :  { %v3245_v9 = vpop.f32.mrf.mxu1 }
 0xe7b   :  { %v1584_v40 = vadd.f32 %v1578_v17, %v1543_v25  ;;  %v4132_v25 = vld [vmem:[%s4380_s4 + $0x8] sm:$0xff]  }
 0xe7c   :  { %v1540_v53 = vpop.f32.mrf.mxu1  ;;  %v4141_v9 = vld [vmem:[%s4383_s7 + $0x8] sm:$0xff]  }
 0xe7d   :  { %3508 = vtanh.f32 %v1584_v40  ;;  %v1585_v54 = vmul.f32 0.5, %v1584_v40  ;;  %v4150_v40 = vld [vmem:[%s4380_s4] sm:$0xff]  }
 0xe7e   :  { %v3246_v38 = vpop.f32.mrf.mxu1  ;;  %v4157_v53 = vld [vmem:[%s4383_s7] sm:$0xff]  }
 0xe80   :  { %v1641_v44 = vpop.f32.mrf.mxu1 }
 0xe81   :  { %v1647_v59 = vadd.f32 %v1641_v44, %v163_v43  ;;  %v4172_v43 = vld [vmem:[%s4382_s8 + $0x8] sm:$0xff]   ;;  %v4181_v44 = vld [vmem:[%s4382_s8] sm:$0xff]  }
 0xe82   :  { %v3507_v45 = vpop.eup %3506  ;;  %v3261_v46 = vpop.f32.mrf.mxu1 }
 0xe83   :  { %3510 = vtanh.f32 %v1647_v59  ;;  %1481 = vrot.lane.b32.xlu1 %v3507_v45, %s3594_s19  ;;  %v1648_v42 = vmul.f32 0.5, %v1647_v59 }
 0xe84   :  { %v1644_v48 = vpop.f32.mrf.mxu1  ;;  %3512 = vtanh.f32 %v1474_v52 }
 0xe85   :  { %3514 = vtanh.f32 %v1585_v54 }
 0xe86   :  { %v3262_v47 = vpop.f32.mrf.mxu1  ;;  %3516 = vtanh.f32 %v1648_v42 }
 0xe8a   :  { %v3509_v49 = vpop.eup %3508 }
 0xe8b   :  { %1592 = vrot.lane.b32.xlu0 %v3509_v49, %s3594_s19 }
 0xe90   :  { %v3511_v51 = vpop.eup %3510 }
 0xe91   :  { %1655 = vrot.lane.b32.xlu0 %v3511_v51, %s3594_s19  ;;  %v3513_v55 = vpop.eup %3512 }
 0xe92   :  { %v1476_v3 = vmul.f32 0.5, %v3513_v55  ;;  %v3515_v60 = vpop.eup %3514 }
 0xe93   :  { %v1587_v19 = vmul.f32 0.5, %v3515_v60  ;;  %v3517_v63 = vpop.eup %3516 }
 0xe94   :  { %v1477_v57 = vadd.f32 0.5, %v1476_v3  ;;  %v1650_v22 = vmul.f32 0.5, %v3517_v63 }
 0xe95   :  { %v1588_v21 = vadd.f32 0.5, %v1587_v19 }
 0xe96   :  { %v1651_v2 = vadd.f32 0.5, %v1650_v22  ;;  %v1479_v5 = vmul.f32 %v1477_v57, %v4015_v58 }
 0xe97   :  { %v1590_v12 = vmul.f32 %v1588_v21, %v4019_v61 }
 0xe98   :  { %v1653_v29 = vmul.f32 %v1651_v2, %v4023_v37 }
 0xef5   :  { %v1482_v6 = vpop.permute.xlu1 %1481 }
 0xef6   :  { %v1484_v62 = vmul.f32 %v1482_v6, %v1477_v57 }
 0xef8   :  { %1486 = vrot.lane.b32.xlu0 %v1484_v62, %s3595_s20  ;;  %v4189_v62 = vld [vmem:[%s4381_s6] ss:$0 sm:$0xff] }
 0xefd   :  { %v1593_v0 = vpop.permute.xlu0 %1592 }
 0xefe   :  { %v1595_v33 = vmul.f32 %v1593_v0, %v1588_v21 }
 0xf00   :  { %1597 = vrot.lane.b32.xlu1 %v1595_v33, %s3595_s20  ;;  %v168_v33 = vadd.f32 %v4082_v56, %v3771_v39 }
 0xf03   :  { %v1656_v36 = vpop.permute.xlu0 %1655 }
 0xf04   :  { %v1658_v4 = vmul.f32 %v1656_v36, %v1651_v2 }
 0xf06   :  { %1660 = vrot.lane.b32.xlu1 %v1658_v4, %s3595_s20 }
 0xf6a   :  { %v1487_v10 = vpop.permute.xlu0 %1486 }
 0xf6b   :  { %v4093_v11 = vadd.f32 %v1487_v10, %v1479_v5 }
 0xf6d   :  { %3518 = vtanh.f32 %v4093_v11 }
 0xf72   :  { %v1598_v13 = vpop.permute.xlu1 %1597 }
 0xf73   :  { %v4097_v14 = vadd.f32 %v1598_v13, %v1590_v12 }
 0xf75   :  { %3520 = vtanh.f32 %v4097_v14 }
 0xf78   :  { %v1661_v32 = vpop.permute.xlu1 %1660 }
 0xf79   :  { %v4101_v26 = vadd.f32 %v1661_v32, %v1653_v29 }
 0xf7a   :  { %v3519_v27 = vpop.eup %3518 }
 0xf7b   :  { %3522 = vtanh.f32 %v4101_v26  ;;  %1492 = vrot.lane.b32.xlu1 %v3519_v27, %s3594_s19 }
 0xf82   :  { %v3521_v58 = vpop.eup %3520 }
 0xf83   :  { %1603 = vrot.lane.b32.xlu0 %v3521_v58, %s3594_s19 }
 0xf88   :  { %v3523_v15 = vpop.eup %3522 }
 0xf89   :  { %1666 = vrot.lane.b32.xlu0 %v3523_v15, %s3594_s19 }
 0xfed   :  { %v1493_v61 = vpop.permute.xlu1 %1492 }
 0xfee   :  { %v1495_v16 = vmul.f32 %v1493_v61, %v1477_v57 }
 0xff0   :  { %v1718_v17 = vpack.c.bf16 %v1495_v16, %v1495_v16 }
 0xff2   :  { %1720 = vrot.lane.b32.xlu0 %v1718_v17, %s3595_s20 }
 0xff5   :  { %v1604_v37 = vpop.permute.xlu0 %1603 }
 0xff6   :  { %v1606_v18 = vmul.f32 %v1604_v37, %v1588_v21 }
 0xff8   :  { %v1670_v20 = vpack.c.bf16 %v1606_v18, %v1606_v18 }
 0xffa   :  { %1672 = vrot.lane.b32.xlu1 %v1670_v20, %s3595_s20 }
 0xffb   :  { %v1667_v8 = vpop.permute.xlu0 %1666 }
 0xffc   :  { %v1669_v23 = vmul.f32 %v1667_v8, %v1651_v2 }
 0xffe   :  { %v1788_v24 = vpack.c.bf16 %v1669_v23, %v1669_v23 }
0x1000   :  { %1790 = vrot.lane.b32.xlu1 %v1788_v24, %s3595_s20 }
0x1064   :  { %v1721_v28 = vpop.permute.xlu0 %1720 }
0x1065   :  { %3276 = vmatmul.mubr.msk.bf16.vlgmr.msra.gmra.mxu1 %vm220_vm3, %v1721_v28 }
0x1066   :  { %3288 = vmatpush3.bf16.msra.mxu1 %v4114_v34  ;;  %3291 = vmatprep.mubr.msk.bf16.mxu1 %vm3592_vm2, %v3591_v1 }
0x1067   :  { %3289 = vmatprep.subr.bf16.mxu1 %v3591_v1 }
0x106a   :  { %3290 = vmatpush3.bf16.msra.mxu1 %v4123_v35 }
0x106b   :  { %3303 = vmatprep.subr.bf16.mxu1 %v3591_v1 }
0x106c   :  { %v1673_v7 = vpop.permute.xlu1 %1672 }
0x106d   :  { %3268 = vmatmul.mubr.msk.bf16.vlgmr.msra.gmra.mxu0 %vm220_vm3, %v1673_v7  ;;  %3292 = vmatmul.mubr.msk.bf16.vlgmr.msra.gmra.mxu1 %vm220_vm3, %v1673_v7 }
0x106e   :  { %3280 = vmatpush3.bf16.msra.mxu0 %v4132_v25  ;;  %3283 = vmatprep.mubr.msk.bf16.mxu0 %vm3592_vm2, %v3591_v1 }
0x106f   :  { %3281 = vmatprep.subr.bf16.mxu0 %v3591_v1  ;;  %3304 = vmatpush3.bf16.msra.mxu1 %v4141_v9 }
0x1070   :  { %3305 = vmatprep.subr.bf16.mxu1 %v3591_v1  ;;  %3307 = vmatprep.mubr.msk.bf16.mxu1 %vm3592_vm2, %v3591_v1 }
0x1072   :  { %3282 = vmatpush3.bf16.msra.mxu0 %v4150_v40  ;;  %v1791_v38 = vpop.permute.xlu1 %1790 }
0x1073   :  { %3295 = vmatprep.subr.bf16.mxu0 %v3591_v1  ;;  %3306 = vmatpush3.bf16.msra.mxu1 %v4157_v53 }
0x1074   :  { %3319 = vmatprep.subr.bf16.mxu1 %v3591_v1 }
0x1075   :  { %3284 = vmatmul.mubr.msk.bf16.vlgmr.msra.gmra.mxu0 %vm220_vm3, %v1791_v38 }
0x1076   :  { %3296 = vmatpush3.bf16.msra.mxu0 %v4057_v30  ;;  %3299 = vmatprep.mubr.msk.bf16.mxu0 %vm3592_vm2, %v3591_v1 }
0x1077   :  { %3297 = vmatprep.subr.bf16.mxu0 %v3591_v1 }
0x107a   :  { %3298 = vmatpush3.bf16.msra.mxu0 %v4066_v31 }
0x107b   :  { %3311 = vmatprep.subr.bf16.mxu0 %v3591_v1 }
0x107d   :  { %3300 = vmatmul.mubr.msk.bf16.vlgmr.msra.gmra.mxu0 %vm220_vm3, %v1791_v38 }
0x107e   :  { %3312 = vmatpush3.bf16.msra.mxu0 %v4172_v43  ;;  %3315 = vmatprep.mubr.msk.bf16.mxu0 %vm3592_vm2, %v3591_v1 }
0x107f   :  { %3313 = vmatprep.subr.bf16.mxu0 %v3591_v1 }
0x1082   :  { %3314 = vmatpush3.bf16.msra.mxu0 %v4181_v44 }
0x1083   :  { %3327 = vmatprep.subr.bf16.mxu0 %v3591_v1 }
0x1125   :  { %v1759_v59 = vpop.f32.mrf.mxu1 }
0x1127   :  { %v3277_v45 = vpop.f32.mrf.mxu1 }
0x1129   :  { %v1762_v46 = vpop.f32.mrf.mxu1 }
0x112b   :  { %v3278_v48 = vpop.f32.mrf.mxu1 }
0x112d   :  { %v1711_v47 = vpop.f32.mrf.mxu0  ;;  %v1870_v49 = vpop.f32.mrf.mxu1 }
0x112e   :  { %v1717_v51 = vadd.f32 %v3877_v50, %v1711_v47 }
0x112f   :  { %v3269_v52 = vpop.f32.mrf.mxu0  ;;  %v3293_v54 = vpop.f32.mrf.mxu1 }
0x1130   :  { %v1765_v42 = vadd.f32 %v1759_v59, %v1717_v51 }
0x1131   :  { %v1714_v55 = vpop.f32.mrf.mxu0  ;;  %v1873_v3 = vpop.f32.mrf.mxu1 }
0x1132   :  { %3524 = vtanh.f32 %v1765_v42  ;;  %v1766_v29 = vmul.f32 0.5, %v1765_v42 }
0x1133   :  { %v3270_v57 = vpop.f32.mrf.mxu0  ;;  %v3294_v60 = vpop.f32.mrf.mxu1 }
0x1135   :  { %v1829_v6 = vpop.f32.mrf.mxu0 }
0x1136   :  { %v1835_v19 = vadd.f32 %v4189_v62, %v1829_v6 }
0x1137   :  { %v3285_v63 = vpop.f32.mrf.mxu0 }
0x1138   :  { %v1876_v21 = vadd.f32 %v1870_v49, %v1835_v19 }
0x1139   :  { %v1832_v0 = vpop.f32.mrf.mxu0 }
0x113a   :  { %3526 = vtanh.f32 %v1876_v21  ;;  %v1877_v32 = vmul.f32 0.5, %v1876_v21 }
0x113b   :  { %v3286_v50 = vpop.f32.mrf.mxu0 }
0x113d   :  { %v1933_v22 = vpop.f32.mrf.mxu0 }
0x113e   :  { %v1939_v2 = vadd.f32 %v1933_v22, %v168_v33 }
0x113f   :  { %v3525_v36 = vpop.eup %3524  ;;  %v3301_v4 = vpop.f32.mrf.mxu0 }
0x1140   :  { %3528 = vtanh.f32 %v1939_v2  ;;  %1773 = vrot.lane.b32.xlu1 %v3525_v36, %s3594_s19  ;;  %v1940_v39 = vmul.f32 0.5, %v1939_v2 }
0x1141   :  { %v1936_v5 = vpop.f32.mrf.mxu0  ;;  %3530 = vtanh.f32 %v1766_v29 }
0x1142   :  { %3532 = vtanh.f32 %v1877_v32  ;;  %v4256_v5 = vld [vmem:[%s4384_s9] ss:$0 sm:$0xff] }
0x1143   :  { %v3302_v10 = vpop.f32.mrf.mxu0  ;;  %3534 = vtanh.f32 %v1940_v39 }
0x1147   :  { %v3527_v12 = vpop.eup %3526 }
0x1148   :  { %1884 = vrot.lane.b32.xlu0 %v3527_v12, %s3594_s19 }
0x114d   :  { %v3529_v13 = vpop.eup %3528 }
0x114e   :  { %1947 = vrot.lane.b32.xlu0 %v3529_v13, %s3594_s19  ;;  %v3531_v27 = vpop.eup %3530 }
0x114f   :  { %v1768_v58 = vmul.f32 0.5, %v3531_v27  ;;  %v3533_v61 = vpop.eup %3532 }
0x1150   :  { %v1879_v37 = vmul.f32 0.5, %v3533_v61  ;;  %v3535_v18 = vpop.eup %3534 }
0x1151   :  { %v1769_v15 = vadd.f32 0.5, %v1768_v58  ;;  %v1942_v24 = vmul.f32 0.5, %v3535_v18 }
0x1152   :  { %v1880_v20 = vadd.f32 0.5, %v1879_v37 }
0x1153   :  { %v1943_v28 = vadd.f32 0.5, %v1942_v24  ;;  %v1771_v59 = vmul.f32 %v1769_v15, %v4093_v11 }
0x1154   :  { %v1882_v48 = vmul.f32 %v1880_v20, %v4097_v14 }
0x1155   :  { %v1945_v51 = vmul.f32 %v1943_v28, %v4101_v26 }
0x11b2   :  { %v1774_v16 = vpop.permute.xlu1 %1773 }
0x11b3   :  { %v1776_v17 = vmul.f32 %v1774_v16, %v1769_v15 }
0x11b5   :  { %1778 = vrot.lane.b32.xlu0 %v1776_v17, %s3595_s20 }
0x11ba   :  { %v1885_v8 = vpop.permute.xlu0 %1884 }
0x11bb   :  { %v1887_v23 = vmul.f32 %v1885_v8, %v1880_v20 }
0x11bd   :  { %1889 = vrot.lane.b32.xlu1 %v1887_v23, %s3595_s20 }
0x11c0   :  { %v1948_v7 = vpop.permute.xlu0 %1947 }
0x11c1   :  { %v1950_v38 = vmul.f32 %v1948_v7, %v1943_v28 }
0x11c3   :  { %1952 = vrot.lane.b32.xlu1 %v1950_v38, %s3595_s20 }
0x1227   :  { %v1779_v45 = vpop.permute.xlu0 %1778 }
0x1228   :  { %v4201_v46 = vadd.f32 %v1779_v45, %v1771_v59 }
0x122a   :  { %3536 = vtanh.f32 %v4201_v46 }
0x122f   :  { %v1890_v47 = vpop.permute.xlu1 %1889 }
0x1230   :  { %v4205_v49 = vadd.f32 %v1890_v47, %v1882_v48 }
0x1232   :  { %3538 = vtanh.f32 %v4205_v49 }
0x1235   :  { %v1953_v52 = vpop.permute.xlu1 %1952 }
0x1236   :  { %v4209_v54 = vadd.f32 %v1953_v52, %v1945_v51 }
0x1237   :  { %v3537_v42 = vpop.eup %3536 }
0x1238   :  { %3540 = vtanh.f32 %v4209_v54  ;;  %1784 = vrot.lane.b32.xlu1 %v3537_v42, %s3594_s19 }
0x123f   :  { %v3539_v11 = vpop.eup %3538 }
0x1240   :  { %1895 = vrot.lane.b32.xlu0 %v3539_v11, %s3594_s19 }
0x1245   :  { %v3541_v55 = vpop.eup %3540 }
0x1246   :  { %1958 = vrot.lane.b32.xlu0 %v3541_v55, %s3594_s19 }
0x12aa   :  { %v1785_v14 = vpop.permute.xlu1 %1784 }
0x12ab   :  { %v1787_v3 = vmul.f32 %v1785_v14, %v1769_v15 }
0x12ad   :  { %v2010_v57 = vpack.c.bf16 %v1787_v3, %v1787_v3 }
0x12af   :  { %2012 = vrot.lane.b32.xlu0 %v2010_v57, %s3595_s20 }
0x12b2   :  { %v1896_v26 = vpop.permute.xlu0 %1895 }
0x12b3   :  { %v1898_v60 = vmul.f32 %v1896_v26, %v1880_v20  ;;  %v171_v20 = vadd.f32 %v4082_v56, %v3775_v41 }
0x12b5   :  { %v1962_v6 = vpack.c.bf16 %v1898_v60, %v1898_v60 }
0x12b7   :  { %1964 = vrot.lane.b32.xlu1 %v1962_v6, %s3595_s20 }
0x12b8   :  { %v1959_v19 = vpop.permute.xlu0 %1958 }
0x12b9   :  { %v1961_v63 = vmul.f32 %v1959_v19, %v1943_v28 }
0x12bb   :  { %v2080_v21 = vpack.c.bf16 %v1961_v63, %v1961_v63 }
0x12bd   :  { %2082 = vrot.lane.b32.xlu1 %v2080_v21, %s3595_s20 }
0x1321   :  { %v2013_v0 = vpop.permute.xlu0 %2012 }
0x1322   :  { %3316 = vmatmul.mubr.msk.bf16.vlgmr.msra.gmra.mxu0 %vm220_vm3, %v2013_v0 }
0x1323   :  { %3328 = vmatpush3.bf16.msra.mxu0 %v4114_v34  ;;  %3331 = vmatprep.mubr.msk.bf16.mxu0 %vm3592_vm2, %v3591_v1 }
0x1324   :  { %3329 = vmatprep.subr.bf16.mxu0 %v3591_v1 }
0x1327   :  { %3330 = vmatpush3.bf16.msra.mxu0 %v4123_v35 }
0x1328   :  { %3343 = vmatprep.subr.bf16.mxu0 %v3591_v1 }
0x1329   :  { %v1965_v50 = vpop.permute.xlu1 %1964 }
0x132a   :  { %3308 = vmatmul.mubr.msk.bf16.vlgmr.msra.gmra.mxu1 %vm220_vm3, %v1965_v50  ;;  %3332 = vmatmul.mubr.msk.bf16.vlgmr.msra.gmra.mxu0 %vm220_vm3, %v1965_v50 }
0x132b   :  { %3320 = vmatpush3.bf16.msra.mxu1 %v4132_v25  ;;  %3323 = vmatprep.mubr.msk.bf16.mxu1 %vm3592_vm2, %v3591_v1 }
0x132c   :  { %3321 = vmatprep.subr.bf16.mxu1 %v3591_v1  ;;  %3344 = vmatpush3.bf16.msra.mxu0 %v4141_v9 }
0x132d   :  { %3345 = vmatprep.subr.bf16.mxu0 %v3591_v1  ;;  %3347 = vmatprep.mubr.msk.bf16.mxu0 %vm3592_vm2, %v3591_v1 }
0x132f   :  { %3322 = vmatpush3.bf16.msra.mxu1 %v4150_v40  ;;  %v2083_v33 = vpop.permute.xlu1 %2082 }
0x1330   :  { %3335 = vmatprep.subr.bf16.mxu1 %v3591_v1  ;;  %3346 = vmatpush3.bf16.msra.mxu0 %v4157_v53 }
0x1331   :  { %3359 = vmatprep.subr.bf16.mxu0 %v3591_v1 }
0x1332   :  { %3324 = vmatmul.mubr.msk.bf16.vlgmr.msra.gmra.mxu1 %vm220_vm3, %v2083_v33 }
0x1333   :  { %3336 = vmatpush3.bf16.msra.mxu1 %v4057_v30  ;;  %3339 = vmatprep.mubr.msk.bf16.mxu1 %vm3592_vm2, %v3591_v1 }
0x1334   :  { %3337 = vmatprep.subr.bf16.mxu1 %v3591_v1 }
0x1337   :  { %3338 = vmatpush3.bf16.msra.mxu1 %v4066_v31 }
0x1338   :  { %3351 = vmatprep.subr.bf16.mxu1 %v3591_v1 }
0x133a   :  { %3340 = vmatmul.mubr.msk.bf16.vlgmr.msra.gmra.mxu1 %vm220_vm3, %v2083_v33 }
0x133b   :  { %3352 = vmatpush3.bf16.msra.mxu1 %v4172_v43  ;;  %3355 = vmatprep.mubr.msk.bf16.mxu1 %vm3592_vm2, %v3591_v1 }
0x133c   :  { %3353 = vmatprep.subr.bf16.mxu1 %v3591_v1 }
0x133f   :  { %3354 = vmatpush3.bf16.msra.mxu1 %v4181_v44 }
0x1340   :  { %3367 = vmatprep.subr.bf16.mxu1 %v3591_v1 }
0x13e2   :  { %v2051_v30 = vpop.f32.mrf.mxu0 }
0x13e4   :  { %v3317_v22 = vpop.f32.mrf.mxu0 }
0x13e6   :  { %v2054_v2 = vpop.f32.mrf.mxu0 }
0x13e8   :  { %v3318_v36 = vpop.f32.mrf.mxu0 }
0x13ea   :  { %v2003_v31 = vpop.f32.mrf.mxu1  ;;  %v2162_v4 = vpop.f32.mrf.mxu0 }
0x13eb   :  { %v2009_v10 = vadd.f32 %v4256_v5, %v2003_v31 }
0x13ec   :  { %v3309_v12 = vpop.f32.mrf.mxu1  ;;  %v3333_v13 = vpop.f32.mrf.mxu0 }
0x13ed   :  { %v2057_v29 = vadd.f32 %v2051_v30, %v2009_v10 }
0x13ee   :  { %v2006_v32 = vpop.f32.mrf.mxu1  ;;  %v2165_v39 = vpop.f32.mrf.mxu0 }
0x13ef   :  { %3542 = vtanh.f32 %v2057_v29  ;;  %v2058_v48 = vmul.f32 0.5, %v2057_v29 }
0x13f0   :  { %v3310_v27 = vpop.f32.mrf.mxu1  ;;  %v3334_v58 = vpop.f32.mrf.mxu0 }
0x13f2   :  { %v2121_v15 = vpop.f32.mrf.mxu1 }
0x13f3   :  { %v2127_v61 = vadd.f32 %v4189_v62, %v2121_v15 }
0x13f4   :  { %v3325_v16 = vpop.f32.mrf.mxu1 }
0x13f5   :  { %v2168_v17 = vadd.f32 %v2162_v4, %v2127_v61 }
0x13f6   :  { %v2124_v37 = vpop.f32.mrf.mxu1 }
0x13f7   :  { %3544 = vtanh.f32 %v2168_v17  ;;  %v2169_v47 = vmul.f32 0.5, %v2168_v17 }
0x13f8   :  { %v3326_v18 = vpop.f32.mrf.mxu1 }
0x13fa   :  { %v2225_v8 = vpop.f32.mrf.mxu1 }
0x13fb   :  { %v2231_v23 = vadd.f32 %v2225_v8, %v171_v20 }
0x13fc   :  { %v3543_v24 = vpop.eup %3542  ;;  %v3341_v28 = vpop.f32.mrf.mxu1 }
0x13fd   :  { %3546 = vtanh.f32 %v2231_v23  ;;  %2065 = vrot.lane.b32.xlu1 %v3543_v24, %s3594_s19  ;;  %v2232_v41 = vmul.f32 0.5, %v2231_v23 }
0x13fe   :  { %v2228_v7 = vpop.f32.mrf.mxu1  ;;  %3548 = vtanh.f32 %v2058_v48 }
0x13ff   :  { %3550 = vtanh.f32 %v2169_v47 }
0x1400   :  { %v3342_v38 = vpop.f32.mrf.mxu1  ;;  %3552 = vtanh.f32 %v2232_v41 }
0x1404   :  { %v3545_v59 = vpop.eup %3544 }
0x1405   :  { %2176 = vrot.lane.b32.xlu0 %v3545_v59, %s3594_s19 }
0x140a   :  { %v3547_v45 = vpop.eup %3546 }
0x140b   :  { %2239 = vrot.lane.b32.xlu0 %v3547_v45, %s3594_s19  ;;  %v3549_v56 = vpop.eup %3548 }
0x140c   :  { %v2060_v51 = vmul.f32 0.5, %v3549_v56  ;;  %v3551_v42 = vpop.eup %3550 }
0x140d   :  { %v2171_v14 = vmul.f32 0.5, %v3551_v42  ;;  %v3553_v3 = vpop.eup %3552 }
0x140e   :  { %v2061_v52 = vadd.f32 0.5, %v2060_v51  ;;  %v2234_v6 = vmul.f32 0.5, %v3553_v3 }
0x140f   :  { %v2172_v57 = vadd.f32 0.5, %v2171_v14 }
0x1410   :  { %v2235_v19 = vadd.f32 0.5, %v2234_v6  ;;  %v2063_v0 = vmul.f32 %v2061_v52, %v4201_v46 }
0x1411   :  { %v2174_v30 = vmul.f32 %v2172_v57, %v4205_v49 }
0x1412   :  { %v2237_v36 = vmul.f32 %v2235_v19, %v4209_v54 }
0x146f   :  { %v2066_v11 = vpop.permute.xlu1 %2065 }
0x1470   :  { %v2068_v55 = vmul.f32 %v2066_v11, %v2061_v52 }
0x1472   :  { %2070 = vrot.lane.b32.xlu0 %v2068_v55, %s3595_s20 }
0x1477   :  { %v2177_v26 = vpop.permute.xlu0 %2176 }
0x1478   :  { %v2179_v60 = vmul.f32 %v2177_v26, %v2172_v57 }
0x147a   :  { %2181 = vrot.lane.b32.xlu1 %v2179_v60, %s3595_s20 }
0x147d   :  { %v2240_v63 = vpop.permute.xlu0 %2239 }
0x147e   :  { %v2242_v21 = vmul.f32 %v2240_v63, %v2235_v19 }
0x1480   :  { %2244 = vrot.lane.b32.xlu1 %v2242_v21, %s3595_s20 }
0x14e4   :  { %v2071_v50 = vpop.permute.xlu0 %2070 }
0x14e5   :  { %v4269_v33 = vadd.f32 %v2071_v50, %v2063_v0 }
0x14e7   :  { %3554 = vtanh.f32 %v4269_v33 }
0x14ec   :  { %v2182_v22 = vpop.permute.xlu1 %2181 }
0x14ed   :  { %v4273_v2 = vadd.f32 %v2182_v22, %v2174_v30 }
0x14ef   :  { %3556 = vtanh.f32 %v4273_v2 }
0x14f2   :  { %v2245_v31 = vpop.permute.xlu1 %2244 }
0x14f3   :  { %v2247_v4 = vadd.f32 %v2245_v31, %v2237_v36 }
0x14f4   :  { %v3555_v10 = vpop.eup %3554 }
0x14f5   :  { %3558 = vtanh.f32 %v2247_v4  ;;  %2076 = vrot.lane.b32.xlu1 %v3555_v10, %s3594_s19 }
0x14fc   :  { %v3557_v46 = vpop.eup %3556 }
0x14fd   :  { %2187 = vrot.lane.b32.xlu0 %v3557_v46, %s3594_s19 }
0x1502   :  { %v3559_v12 = vpop.eup %3558 }
0x1503   :  { %2250 = vrot.lane.b32.xlu0 %v3559_v12, %s3594_s19 }
0x1567   :  { %v2077_v49 = vpop.permute.xlu1 %2076 }
0x1568   :  { %v2079_v13 = vmul.f32 %v2077_v49, %v2061_v52 }
0x156a   :  { %v2302_v29 = vpack.c.bf16 %v2079_v13, %v2079_v13 }
0x156c   :  { %2304 = vrot.lane.b32.xlu0 %v2302_v29, %s3595_s20 }
0x156f   :  { %v2188_v32 = vpop.permute.xlu0 %2187 }
0x1570   :  { %v2190_v39 = vmul.f32 %v2188_v32, %v2172_v57 }
0x1572   :  { %v2254_v54 = vpack.c.bf16 %v2190_v39, %v2190_v39 }
0x1574   :  { %2256 = vrot.lane.b32.xlu1 %v2254_v54, %s3595_s20 }
0x1575   :  { %v2251_v27 = vpop.permute.xlu0 %2250 }
0x1576   :  { %v2253_v58 = vmul.f32 %v2251_v27, %v2235_v19 }
0x1578   :  { %v2372_v15 = vpack.c.bf16 %v2253_v58, %v2253_v58 }
0x157a   :  { %2374 = vrot.lane.b32.xlu1 %v2372_v15, %s3595_s20 }
0x15de   :  { %v2305_v61 = vpop.permute.xlu0 %2304 }
0x15df   :  { %3356 = vmatmul.mubr.msk.bf16.vlgmr.msra.gmra.mxu1 %vm220_vm3, %v2305_v61 }
0x15e0   :  { %3368 = vmatpush3.bf16.msra.mxu1 %v4114_v34  ;;  %3371 = vmatprep.mubr.msk.bf16.mxu1 %vm3592_vm2, %v3591_v1 }
0x15e1   :  { %3369 = vmatprep.subr.bf16.mxu1 %v3591_v1 }
0x15e4   :  { %3370 = vmatpush3.bf16.msra.mxu1 %v4123_v35 }
0x15e5   :  { %3383 = vmatprep.subr.bf16.mxu1 %v3591_v1 }
0x15e6   :  { %v2257_v16 = vpop.permute.xlu1 %2256 }
0x15e7   :  { %3348 = vmatmul.mubr.msk.bf16.vlgmr.msra.gmra.mxu0 %vm220_vm3, %v2257_v16  ;;  %3372 = vmatmul.mubr.msk.bf16.vlgmr.msra.gmra.mxu1 %vm220_vm3, %v2257_v16 }
0x15e8   :  { %3360 = vmatpush3.bf16.msra.mxu0 %v4132_v25  ;;  %3363 = vmatprep.mubr.msk.bf16.mxu0 %vm3592_vm2, %v3591_v1 }
0x15e9   :  { %3361 = vmatprep.subr.bf16.mxu0 %v3591_v1  ;;  %3384 = vmatpush3.bf16.msra.mxu1 %v4172_v43 }
0x15ea   :  { %3385 = vmatprep.subr.bf16.mxu1 %v3591_v1  ;;  %3387 = vmatprep.mubr.msk.bf16.mxu1 %vm3592_vm2, %v3591_v1 }
0x15ec   :  { %3362 = vmatpush3.bf16.msra.mxu0 %v4150_v40  ;;  %v2375_v34 = vpop.permute.xlu1 %2374 }
0x15ed   :  { %3386 = vmatpush3.bf16.msra.mxu1 %v4181_v44  ;;  %3375 = vmatprep.subr.bf16.mxu0 %v3591_v1 }
0x15ee   :  { %3409 = vmatprep.subr.mxu1 %v3591_v1 }
0x15ef   :  { %3364 = vmatmul.mubr.msk.bf16.vlgmr.msra.gmra.mxu0 %vm220_vm3, %v2375_v34 }
0x15f0   :  { %3376 = vmatpush3.bf16.msra.mxu0 %v4141_v9  ;;  %3379 = vmatprep.mubr.msk.bf16.mxu0 %vm3592_vm2, %v3591_v1 }
0x15f1   :  { %3377 = vmatprep.subr.bf16.mxu0 %v3591_v1 }
0x15f4   :  { %3378 = vmatpush3.bf16.msra.mxu0 %v4157_v53 }
0x15f5   :  { %3391 = vmatprep.subr.mxu0 %v3591_v1 }
0x169f   :  { %v2343_v35 = vpop.f32.mrf.mxu1 }
0x16a1   :  { %v3357_v25 = vpop.f32.mrf.mxu1 }
0x16a3   :  { %v2346_v40 = vpop.f32.mrf.mxu1 }
0x16a5   :  { %v3358_v43 = vpop.f32.mrf.mxu1 }
0x16a7   :  { %v2295_v44 = vpop.f32.mrf.mxu0  ;;  %v2454_v17 = vpop.f32.mrf.mxu1 }
0x16a8   :  { %v2301_v37 = vadd.f32 %v4256_v5, %v2295_v44 }
0x16a9   :  { %v3349_v18 = vpop.f32.mrf.mxu0  ;;  %v3373_v20 = vpop.f32.mrf.mxu1 }
0x16aa   :  { %v2349_v9 = vadd.f32 %v2343_v35, %v2301_v37  ;;  %v2606_v18 = vld [vmem:[%s4385_s10 + $0x18] sm:$0xff]  ;;  %v2605_v20 = vld [vmem:[%s4385_s10 + $0x10] sm:$0xff] }
0x16ab   :  { %v2298_v8 = vpop.f32.mrf.mxu0  ;;  %v2457_v23 = vpop.f32.mrf.mxu1 }
0x16ac   :  { %3560 = vtanh.f32 %v2349_v9  ;;  %v2350_v56 = vmul.f32 0.5, %v2349_v9  ;;  %v2604_v9 = vld [vmem:[%s4385_s10 + $0x8] sm:$0xff]  ;;  %v2603_v8 = vld [vmem:[%s4385_s10] sm:$0xff] }
0x16ad   :  { %v3350_v24 = vpop.f32.mrf.mxu0  ;;  %v3374_v28 = vpop.f32.mrf.mxu1 }
0x16af   :  { %v2413_v7 = vpop.f32.mrf.mxu0 }
0x16b0   :  { %v2419_v53 = vadd.f32 %v4189_v62, %v2413_v7 }
0x16b1   :  { %v3365_v38 = vpop.f32.mrf.mxu0 }
0x16b2   :  { %v2460_v59 = vadd.f32 %v2454_v17, %v2419_v53 }
0x16b3   :  { %v2416_v45 = vpop.f32.mrf.mxu0 }
0x16b4   :  { %3562 = vtanh.f32 %v2460_v59  ;;  %v2461_v51 = vmul.f32 0.5, %v2460_v59  ;;  %v2691_v59 = vld [vmem:[%s4386_s12 + $0x8] sm:$0xff]  ;;  %v2690_v45 = vld [vmem:[%s4386_s12] sm:$0xff] }
0x16b5   :  { %v3366_v48 = vpop.f32.mrf.mxu0  ;;  %3564 = vtanh.f32 %v2350_v56 }
0x16b6   :  { %3566 = vtanh.f32 %v2461_v51  ;;  %v2774_v48 = vld [vmem:[%s4387_s14] sm:$0xff] }
0x16b9   :  { %v3561_v47 = vpop.eup %3560 }
0x16ba   :  { %2357 = vrot.lane.b32.xlu1 %v3561_v47, %s3594_s19  ;;  %v2920_v47 = vld [vmem:[%s4388_s11] ss:$0 sm:$0xff] }
0x16c1   :  { %v3563_v41 = vpop.eup %3562 }
0x16c2   :  { %2468 = vrot.lane.b32.xlu0 %v3563_v41, %s3594_s19  ;;  %v3565_v52 = vpop.eup %3564 }
0x16c3   :  { %v2352_v42 = vmul.f32 0.5, %v3565_v52  ;;  %v3567_v55 = vpop.eup %3566 }
0x16c4   :  { %v2463_v3 = vmul.f32 0.5, %v3567_v55 }
0x16c5   :  { %v2353_v11 = vadd.f32 0.5, %v2352_v42  ;;  %v2922_v42 = vld [vmem:[%s4390_s13] ss:$0 sm:$0xff] }
0x16c6   :  { %v2464_v57 = vadd.f32 0.5, %v2463_v3 }
0x16c7   :  { %v2355_v6 = vmul.f32 %v2353_v11, %v4269_v33 }
0x16c8   :  { %v2466_v21 = vmul.f32 %v2464_v57, %v4273_v2 }
0x172c   :  { %v2358_v62 = vpop.permute.xlu1 %2357 }
0x172d   :  { %v2360_v14 = vmul.f32 %v2358_v62, %v2353_v11 }
0x172f   :  { %2362 = vrot.lane.b32.xlu1 %v2360_v14, %s3595_s20 }
0x1734   :  { %v2469_v26 = vpop.permute.xlu0 %2468 }
0x1735   :  { %v2471_v60 = vmul.f32 %v2469_v26, %v2464_v57 }
0x1737   :  { %2473 = vrot.lane.b32.xlu0 %v2471_v60, %s3595_s20 }
0x17a1   :  { %v2363_v19 = vpop.permute.xlu1 %2362 }
0x17a2   :  { %v2365_v63 = vadd.f32 %v2363_v19, %v2355_v6 }
0x17a4   :  { %3568 = vtanh.f32 %v2365_v63 }
0x17a9   :  { %v2474_v0 = vpop.permute.xlu0 %2473 }
0x17aa   :  { %v2476_v50 = vadd.f32 %v2474_v0, %v2466_v21 }
0x17ac   :  { %3570 = vtanh.f32 %v2476_v50 }
0x17b1   :  { %v3569_v30 = vpop.eup %3568 }
0x17b2   :  { %2368 = vrot.lane.b32.xlu1 %v3569_v30, %s3594_s19 }
0x17b9   :  { %v3571_v22 = vpop.eup %3570 }
0x17ba   :  { %2479 = vrot.lane.b32.xlu0 %v3571_v22, %s3594_s19 }
0x1824   :  { %v2369_v36 = vpop.permute.xlu1 %2368 }
0x1825   :  { %v2371_v31 = vmul.f32 %v2369_v36, %v2353_v11 }
0x1827   :  { %v2531_v4 = vpack.c.bf16 %v2371_v31, %v2371_v31 }
0x1829   :  { %2533 = vrot.lane.b32.xlu1 %v2531_v4, %s3595_s20 }
0x182c   :  { %v2480_v33 = vpop.permute.xlu0 %2479 }
0x182d   :  { %v2482_v10 = vmul.f32 %v2480_v33, %v2464_v57 }
0x182f   :  { %v2483_v46 = vpack.c.bf16 %v2482_v10, %v2482_v10 }
0x1831   :  { %2485 = vrot.lane.b32.xlu0 %v2483_v46, %s3595_s20 }
0x189b   :  { %v2534_v2 = vpop.permute.xlu1 %2533 }
0x189c   :  { %3388 = vmatmul.mubr.msk.bf16.vlgmr.msra.gmra.mxu1 %vm220_vm3, %v2534_v2 }
0x189d   :  { %3411 = vmatprep.mubr.msk.f32.mxu1 %vm3592_vm2, %v3591_v1  ;;  %3410 = vmatpush3.msra.mxu1 %v2774_v48 }
0x18a3   :  { %v2486_v12 = vpop.permute.xlu0 %2485 }
0x18a4   :  { %3380 = vmatmul.mubr.msk.bf16.vlgmr.msra.gmra.mxu0 %vm220_vm3, %v2486_v12 }
0x18a5   :  { %3399 = vmatprep.mubr.msk.f32.mxu0 %vm3592_vm2, %v3591_v1  ;;  %3392 = vmatpush3.msra.mxu0 %v2606_v18 }
0x18a6   :  { %3393 = vmatprep.subr.mxu0 %v3591_v1 }
0x18a7   :  { %3394 = vmatpush3.msra.mxu0 %v2605_v20 }
0x18a8   :  { %3395 = vmatprep.subr.mxu0 %v3591_v1 }
0x18a9   :  { %3396 = vmatpush3.msra.mxu0 %v2604_v9 }
0x18aa   :  { %3397 = vmatprep.subr.mxu0 %v3591_v1 }
0x18ab   :  { %3398 = vmatpush3.msra.mxu0 %v2603_v8 }
0x18ac   :  { %3402 = vmatprep.subr.mxu0 %v3591_v1 }
0x195c   :  { %v2572_v49 = vpop.f32.mrf.mxu1 }
0x195e   :  { %v3389_v13 = vpop.f32.mrf.mxu1 }
0x1960   :  { %v2575_v29 = vpop.f32.mrf.mxu1 }
0x1962   :  { %v3390_v32 = vpop.f32.mrf.mxu1 }
0x1964   :  { %v2524_v39 = vpop.f32.mrf.mxu0 }
0x1965   :  { %v2530_v54 = vadd.f32 %v4256_v5, %v2524_v39 }
0x1966   :  { %v3381_v27 = vpop.f32.mrf.mxu0 }
0x1967   :  { %v2578_v58 = vadd.f32 %v2572_v49, %v2530_v54 }
0x1968   :  { %v2527_v15 = vpop.f32.mrf.mxu0 }
0x1969   :  { %3572 = vtanh.f32 %v2578_v58  ;;  %v2579_v34 = vmul.f32 0.5, %v2578_v58 }
0x196a   :  { %v3382_v61 = vpop.f32.mrf.mxu0 }
0x196b   :  { %3574 = vtanh.f32 %v2579_v34 }
0x1976   :  { %v3573_v16 = vpop.eup %3572 }
0x1977   :  { %2586 = vrot.lane.b32.xlu0 %v3573_v16, %s3594_s19 }
0x1978   :  { %v3575_v35 = vpop.eup %3574 }
0x1979   :  { %v2581_v25 = vmul.f32 0.5, %v3575_v35 }
0x197b   :  { %v2582_v40 = vadd.f32 0.5, %v2581_v25 }
0x197d   :  { %v2584_v17 = vmul.f32 %v2582_v40, %v2365_v63 }
0x19e9   :  { %v2587_v43 = vpop.permute.xlu0 %2586 }
0x19ea   :  { %v2589_v44 = vmul.f32 %v2587_v43, %v2582_v40 }
0x19ec   :  { %2591 = vrot.lane.b32.xlu1 %v2589_v44, %s3595_s20 }
0x1a5e   :  { %v2592_v37 = vpop.permute.xlu1 %2591 }
0x1a5f   :  { %v2594_v5 = vadd.f32 %v2592_v37, %v2584_v17 }
0x1a61   :  { %3576 = vtanh.f32 %v2594_v5 }
0x1a6e   :  { %v3577_v23 = vpop.eup %3576 }
0x1a6f   :  { %2597 = vrot.lane.b32.xlu0 %v3577_v23, %s3594_s19 }
0x1ae1   :  { %v2598_v24 = vpop.permute.xlu0 %2597 }
0x1ae2   :  { %v2600_v28 = vmul.f32 %v2598_v24, %v2582_v40 }
0x1ae4   :  { %v2601_v7 = vadd.f32 %v2600_v28, %v2482_v10 }
0x1ae6   :  { %v2602_v53 = vmax.f32 %v2601_v7, 0.0 }
0x1ae8   :  { %2615 = vrot.lane.b32.xlu1 %v2602_v53, %s3595_s20 }
0x1b5a   :  { %v2616_v38 = vpop.permute.xlu1 %2615 }
0x1b5b   :  { %3400 = vmatmul.mubr.msk.f32.vlgmr.msra.gmra.mxu0 %vm220_vm3, %v2616_v38 }
0x1b5c   :  { %3406 = vmatprep.mubr.msk.f32.mxu0 %vm3592_vm2, %v3591_v1  ;;  %3403 = vmatpush3.msra.mxu0 %v2691_v59 }
0x1b5d   :  { %3404 = vmatprep.subr.mxu0 %v3591_v1  ;;  %v21_v1 = vstv %s4389_s15 }
0x1b5e   :  { %3405 = vmatpush3.msra.mxu0 %v2690_v45  ;;  %22 = vst [vmem:[#allocation2] sm:$0x1] %v21_v1 }
0x1b65   :  { %v2924_v3 = vld [vmem:[#allocation2] ss:$0 sm:$0xff] }
0x1c1b   :  { %v2685_v41 = vpop.f32.mrf.mxu0 }
0x1c1c   :  { %v2686_v56 = vadd.f32 %v2920_v47, %v2685_v41 }
0x1c1d   :  { %v3401_v51 = vpop.f32.mrf.mxu0 }
0x1c1e   :  { %v2689_v52 = vmax.f32 %v2686_v56, 0.0 }
0x1c20   :  { %3407 = vmatmul.mubr.msk.f32.vlgmr.msra.gmra.mxu0 %vm2699_vm4, %v2689_v52 }
0x1ce0   :  { %v2769_v11 = vpop.f32.mrf.mxu0 }
0x1ce1   :  { %v2770_v55 = vadd.f32 %v2922_v42, %v2769_v11 }
0x1ce2   :  { %v3408_v62 = vpop.f32.mrf.mxu0 }
0x1ce3   :  { %v2773_v14 = vmax.f32 %v2770_v55, 0.0 }
0x1ce5   :  { %3412 = vmatmul.mubr.msk.f32.vlgmr.msra.gmra.mxu1 %vm2782_vm5, %v2773_v14 }
0x1da5   :  { %v2852_v57 = vpop.f32.mrf.mxu1 }
0x1da6   :  { %v2853_v26 = vadd.f32 %v2924_v3, %v2852_v57 }
0x1da7   :  { %v3413_v60 = vpop.f32.mrf.mxu1 }
0x1da8   :  { %2857 = vst.msk [vmem:[%s4391_s16] sm:$0xff] %vm2856_vm6, %v2853_v26 }

</bundles_post_ra>
